<compile_context>
chip_gen: v7x
topology: tpu7x:2x2x1
jax: 0.10.0
libtpu: 0.0.40
codegen_flags: <defaults>
</compile_context>

<pallas_src>
import functools

import jax
import jax.numpy as jnp
from jax import lax
from jax.experimental import pallas as pl
from jax.experimental.pallas import tpu as pltpu

# ---- model hyper-parameters (small, ViT-like) -------------------------------
BATCH      = 2
TOKENS     = 8          # num_patches (+cls) -- kept small
EMBED      = 128        # embed_dims, lane-friendly
NUM_HEADS  = 4
HEAD_DIM   = EMBED // NUM_HEADS
MLP_SIZE   = 256
SCALE      = 1.0 / (HEAD_DIM ** 0.5)
LN_EPS     = 1e-5
INV_SQRT2  = 0.7071067811865476


def encoder_kernel(x_ref, gamma_ref, beta_ref,
                   wqkv_ref, bqkv_ref, wproj_ref, bproj_ref,
                   w1_ref, b1_ref, w2_ref, b2_ref,
                   o_ref, *, batch, tokens):
    f32 = jnp.float32
    bf16 = jnp.bfloat16

    x = x_ref[...].astype(f32)                 # (N, D), N = batch * tokens
    n, d = x.shape

    # Hoist the LayerNorm affine broadcasts once (JAX does not CSE them).
    gamma_b = jnp.broadcast_to(gamma_ref[...].astype(f32), (n, d))
    beta_b = jnp.broadcast_to(beta_ref[...].astype(f32), (n, d))

    def layernorm(v):
        mean = jnp.mean(v, axis=-1, keepdims=True)
        var = jnp.mean((v - mean) ** 2, axis=-1, keepdims=True)
        return (v - mean) * lax.rsqrt(var + LN_EPS) * gamma_b + beta_b

    # ----- Multi-Head Self-Attention on LayerNorm(x) -----
    h_bf = layernorm(x).astype(bf16)           # bf16 matmul input, f32 accum

    # Fused QKV projection: one (N, D) x (D, 3D) MXU pass. SCALE is already
    # folded into the q columns of wqkv / bqkv (prepare_params).
    qkv = jnp.dot(h_bf, wqkv_ref[...], preferred_element_type=f32) + bqkv_ref[...]

    # 128-aligned lane slices of the fused result (free); columns within each
    # block are ordered [H, hd], matching the torch reshape (.., 3, H, hd).
    q_all = qkv[:, :d].astype(bf16)            # (N, D)
    k_all = qkv[:, d:2 * d].astype(bf16)
    v_all = qkv[:, 2 * d:].astype(bf16)

    # Per-head attention core. T x T = 8 x 8, hd = 32: negligible MXU work,
    # so the small per-head slices/einsums are not the bottleneck.
    ctx_heads = []
    for hh in range(NUM_HEADS):
        lo, hi = hh * HEAD_DIM, (hh + 1) * HEAD_DIM
        q3 = q_all[:, lo:hi].reshape(batch, tokens, HEAD_DIM)
        k3 = k_all[:, lo:hi].reshape(batch, tokens, HEAD_DIM)
        v3 = v_all[:, lo:hi].reshape(batch, tokens, HEAD_DIM)

        s = jnp.einsum('bqe,bke->bqk', q3, k3, preferred_element_type=f32)
        s = s - jnp.max(s, axis=-1, keepdims=True)
        p = jnp.exp(s)
        p = p * pl.reciprocal(jnp.sum(p, axis=-1, keepdims=True), approx=True)
        ctx = jnp.einsum('bqk,bke->bqe', p.astype(bf16), v3,
                         preferred_element_type=f32)       # (B, T, hd)
        ctx_heads.append(ctx.reshape(n, HEAD_DIM))

    # Head-concatenated context -> single full-K (N, D) x (D, D) projection.
    ctx_cat = jnp.concatenate(ctx_heads, axis=-1).astype(bf16)   # (N, D)
    attn = jnp.dot(ctx_cat, wproj_ref[...], preferred_element_type=f32) + bproj_ref[...]
    out1 = attn + x                            # first residual (f32)

    # ----- MLP on LayerNorm(out1) (same LayerNorm params, as in torch code) -----
    h2 = layernorm(out1).astype(bf16)
    m = jnp.dot(h2, w1_ref[...], preferred_element_type=f32) + b1_ref[...]
    # exact GELU (erf-based), matching nn.GELU() default
    m = 0.5 * m * (1.0 + lax.erf(m * INV_SQRT2))
    m = jnp.dot(m.astype(bf16), w2_ref[...], preferred_element_type=f32) + b2_ref[...]

    o_ref[...] = (m + out1).astype(o_ref.dtype)    # second residual


def prepare_params(params):
    """One-time re-layout: fold SCALE into the q columns, cast weights to bf16
    (biases / norm params stay f32).  Call once at init, NOT per forward."""
    f32, bf16 = jnp.float32, jnp.bfloat16
    D = EMBED
    col_scale = jnp.concatenate(
        [jnp.full((D,), SCALE, f32), jnp.ones((2 * D,), f32)])[None, :]
    return {
        "gamma": params["gamma"].astype(f32),            # (1, D)
        "beta":  params["beta"].astype(f32),             # (1, D)
        "wqkv":  (params["wqkv"] * col_scale).astype(bf16),   # (D, 3D), fused
        "bqkv":  (params["bqkv"] * col_scale).astype(f32),    # (1, 3D)
        "wproj": params["wproj"].astype(bf16),           # (D, D), fused
        "bproj": params["bproj"].astype(f32),            # (1, D)
        "w1":    params["w1"].astype(bf16),              # (D, MLP)
        "b1":    params["b1"].astype(f32),               # (1, MLP)
        "w2":    params["w2"].astype(bf16),              # (MLP, D)
        "b2":    params["b2"].astype(f32),               # (1, D)
    }


@jax.jit
def transformer_encoder(x, prepped):
    B, T, D = x.shape
    N = B * T
    x_flat = x.reshape(N, D)

    operands = (x_flat, prepped["gamma"], prepped["beta"],
                prepped["wqkv"], prepped["bqkv"],
                prepped["wproj"], prepped["bproj"],
                prepped["w1"], prepped["b1"], prepped["w2"], prepped["b2"])

    def full_spec(a):
        nd = a.ndim
        return pl.BlockSpec(a.shape, lambda i, _nd=nd: (0,) * _nd)

    flops = (2 * N * D * 3 * D                       # fused qkv projection
             + 2 * B * NUM_HEADS * T * T * HEAD_DIM * 2   # scores + attn*values
             + 2 * N * D * D                         # output projection
             + 2 * N * D * MLP_SIZE * 2)             # fc1 + fc2
    transcendentals = B * NUM_HEADS * T * T + N * MLP_SIZE + 2 * N
    bytes_accessed = (sum(int(a.size) * a.dtype.itemsize for a in operands)
                      + N * D * x.dtype.itemsize)

    out = pl.pallas_call(
        functools.partial(encoder_kernel, batch=B, tokens=T),
        out_shape=jax.ShapeDtypeStruct((N, D), x.dtype),
        grid_spec=pltpu.PrefetchScalarGridSpec(
            num_scalar_prefetch=0,
            grid=(1,),                       # one step: whole slab in one block
            in_specs=[full_spec(a) for a in operands],
            out_specs=pl.BlockSpec((N, D), lambda i: (0, 0)),
        ),
        compiler_params=pltpu.CompilerParams(
            dimension_semantics=("arbitrary",)),
        cost_estimate=pl.CostEstimate(
            flops=flops,
            transcendentals=transcendentals,
            bytes_accessed=bytes_accessed),
    )(*operands)
    return out.reshape(B, T, D)


def reference_encoder(x, params):
    """Pure-JAX f32 reference mirroring the PyTorch forward exactly (eval mode)."""
    gamma, beta = params["gamma"][0], params["beta"][0]

    def ln(v):
        mean = jnp.mean(v, axis=-1, keepdims=True)
        var = jnp.mean((v - mean) ** 2, axis=-1, keepdims=True)
        return (v - mean) / jnp.sqrt(var + LN_EPS) * gamma + beta

    B, T, D = x.shape
    h = ln(x)
    qkv = h @ params["wqkv"] + params["bqkv"][0]
    qkv = qkv.reshape(B, T, 3, NUM_HEADS, HEAD_DIM).transpose(2, 0, 3, 1, 4)
    q, k, v = qkv[0], qkv[1], qkv[2]
    s = jnp.einsum("bhqd,bhkd->bhqk", q, k) * SCALE
    p = jax.nn.softmax(s, axis=-1)
    wv = jnp.einsum("bhqk,bhkd->bhqd", p, v)
    wv = wv.transpose(0, 2, 1, 3).reshape(B, T, D)
    attn = wv @ params["wproj"] + params["bproj"][0]
    out1 = attn + x
    h2 = ln(out1)
    m = h2 @ params["w1"] + params["b1"][0]
    m = 0.5 * m * (1.0 + lax.erf(m * INV_SQRT2))
    m = m @ params["w2"] + params["b2"][0]
    return m + out1


def init_params(key):
    ks = jax.random.split(key, 8)
    f32 = jnp.float32
    return {
        "gamma": jnp.ones((1, EMBED), f32),
        "beta": jnp.zeros((1, EMBED), f32),
        "wqkv": jax.random.normal(ks[0], (EMBED, 3 * EMBED), f32) * 0.02,
        "bqkv": jax.random.normal(ks[1], (1, 3 * EMBED), f32) * 0.02,
        "wproj": jax.random.normal(ks[2], (EMBED, EMBED), f32) * 0.02,
        "bproj": jax.random.normal(ks[3], (1, EMBED), f32) * 0.02,
        "w1": jax.random.normal(ks[4], (EMBED, MLP_SIZE), f32) * 0.02,
        "b1": jax.random.normal(ks[5], (1, MLP_SIZE), f32) * 0.02,
        "w2": jax.random.normal(ks[6], (MLP_SIZE, EMBED), f32) * 0.02,
        "b2": jax.random.normal(ks[7], (1, EMBED), f32) * 0.02,
    }


if __name__ == "__main__":
    key = jax.random.PRNGKey(0)
    k_x, k_p = jax.random.split(key)
    x = jax.random.normal(k_x, (BATCH, TOKENS, EMBED), jnp.float32)
    params = init_params(k_p)

    # One-time parameter re-layout (hoisted out of the forward hot path).
    prepped = prepare_params(params)
    prepped = jax.tree_util.tree_map(jax.block_until_ready, prepped)

    out = transformer_encoder(x, prepped)
    out = jax.block_until_ready(out)

    ref = reference_encoder(x, params)
    assert out.shape == (BATCH, TOKENS, EMBED)
    # bf16 matmul inputs with f32 accumulation in the kernel -> relaxed
    # tolerance vs. the pure-f32 reference.
    max_err = jnp.max(jnp.abs(out - ref))
    assert max_err < 2e-2, f"max err {max_err}"

    print("KERNEL_OK")
</pallas_src>

<mosaic_0001>
module attributes {stable_mosaic.version = 11 : i64} {
  func.func @encoder_kernel(%arg0: i32, %arg1: memref<16x128xf32, #tpu.memory_space<vmem>>, %arg2: memref<1x128xf32, #tpu.memory_space<vmem>>, %arg3: memref<1x128xf32, #tpu.memory_space<vmem>>, %arg4: memref<128x384xbf16, #tpu.memory_space<vmem>>, %arg5: memref<1x384xf32, #tpu.memory_space<vmem>>, %arg6: memref<128x128xbf16, #tpu.memory_space<vmem>>, %arg7: memref<1x128xf32, #tpu.memory_space<vmem>>, %arg8: memref<128x256xbf16, #tpu.memory_space<vmem>>, %arg9: memref<1x256xf32, #tpu.memory_space<vmem>>, %arg10: memref<256x128xbf16, #tpu.memory_space<vmem>>, %arg11: memref<1x128xf32, #tpu.memory_space<vmem>>, %arg12: memref<16x128xf32, #tpu.memory_space<vmem>>) attributes {dimension_semantics = [#tpu.dimension_semantics<arbitrary>], iteration_bounds = array<i64: 1>, scalar_prefetch = 0 : i64, scratch_operands = 0 : i64, tpu.core_type = #tpu.core_type<tc>, window_params = [{pipeline_mode = #tpu.pipeline_mode<synchronous>, transform_indices = @transform_0, window_bounds = array<i64: 16, 128>}, {pipeline_mode = #tpu.pipeline_mode<synchronous>, transform_indices = @transform_1, window_bounds = array<i64: 1, 128>}, {pipeline_mode = #tpu.pipeline_mode<synchronous>, transform_indices = @transform_2, window_bounds = array<i64: 1, 128>}, {pipeline_mode = #tpu.pipeline_mode<synchronous>, transform_indices = @transform_3, window_bounds = array<i64: 128, 384>}, {pipeline_mode = #tpu.pipeline_mode<synchronous>, transform_indices = @transform_4, window_bounds = array<i64: 1, 384>}, {pipeline_mode = #tpu.pipeline_mode<synchronous>, transform_indices = @transform_5, window_bounds = array<i64: 128, 128>}, {pipeline_mode = #tpu.pipeline_mode<synchronous>, transform_indices = @transform_6, window_bounds = array<i64: 1, 128>}, {pipeline_mode = #tpu.pipeline_mode<synchronous>, transform_indices = @transform_7, window_bounds = array<i64: 128, 256>}, {pipeline_mode = #tpu.pipeline_mode<synchronous>, transform_indices = @transform_8, window_bounds = array<i64: 1, 256>}, {pipeline_mode = #tpu.pipeline_mode<synchronous>, transform_indices = @transform_9, window_bounds = array<i64: 256, 128>}, {pipeline_mode = #tpu.pipeline_mode<synchronous>, transform_indices = @transform_10, window_bounds = array<i64: 1, 128>}, {pipeline_mode = #tpu.pipeline_mode<synchronous>, transform_indices = @transform_11, window_bounds = array<i64: 16, 128>}]} {
    %c0 = arith.constant 0 : index
    %c0_0 = arith.constant 0 : index
    %0 = vector.load %arg1[%c0, %c0_0] : memref<16x128xf32, #tpu.memory_space<vmem>>, vector<16x128xf32>
    %c0_1 = arith.constant 0 : index
    %c0_2 = arith.constant 0 : index
    %1 = vector.load %arg2[%c0_1, %c0_2] : memref<1x128xf32, #tpu.memory_space<vmem>>, vector<1x128xf32>
    %2 = vector.shape_cast %1 : vector<1x128xf32> to vector<1x128xf32>
    %3 = vector.broadcast %2 : vector<1x128xf32> to vector<16x128xf32>
    %c0_3 = arith.constant 0 : index
    %c0_4 = arith.constant 0 : index
    %4 = vector.load %arg3[%c0_3, %c0_4] : memref<1x128xf32, #tpu.memory_space<vmem>>, vector<1x128xf32>
    %5 = vector.shape_cast %4 : vector<1x128xf32> to vector<1x128xf32>
    %6 = vector.broadcast %5 : vector<1x128xf32> to vector<16x128xf32>
    %cst = arith.constant dense<0.000000e+00> : vector<16xf32>
    %7 = vector.multi_reduction <add>, %0, %cst [1] : vector<16x128xf32> to vector<16xf32>
    %8 = vector.shape_cast %7 : vector<16xf32> to vector<16x1xf32>
    %cst_5 = arith.constant 1.280000e+02 : f32
    %9 = vector.broadcast %cst_5 : f32 to vector<16x1xf32>
    %10 = arith.divf %8, %9 : vector<16x1xf32>
    %11 = vector.broadcast %10 : vector<16x1xf32> to vector<16x128xf32>
    %12 = arith.subf %0, %11 : vector<16x128xf32>
    %13 = arith.mulf %12, %12 : vector<16x128xf32>
    %cst_6 = arith.constant dense<0.000000e+00> : vector<16xf32>
    %14 = vector.multi_reduction <add>, %13, %cst_6 [1] : vector<16x128xf32> to vector<16xf32>
    %15 = vector.shape_cast %14 : vector<16xf32> to vector<16x1xf32>
    %cst_7 = arith.constant 1.280000e+02 : f32
    %16 = vector.broadcast %cst_7 : f32 to vector<16x1xf32>
    %17 = arith.divf %15, %16 : vector<16x1xf32>
    %18 = vector.broadcast %10 : vector<16x1xf32> to vector<16x128xf32>
    %19 = arith.subf %0, %18 : vector<16x128xf32>
    %cst_8 = arith.constant 9.99999974E-6 : f32
    %20 = vector.broadcast %cst_8 : f32 to vector<16x1xf32>
    %21 = arith.addf %17, %20 : vector<16x1xf32>
    %22 = math.rsqrt %21 : vector<16x1xf32>
    %23 = vector.broadcast %22 : vector<16x1xf32> to vector<16x128xf32>
    %24 = arith.mulf %19, %23 : vector<16x128xf32>
    %25 = arith.mulf %24, %3 : vector<16x128xf32>
    %26 = arith.addf %25, %6 : vector<16x128xf32>
    %27 = arith.truncf %26 : vector<16x128xf32> to vector<16x128xbf16>
    %c0_9 = arith.constant 0 : index
    %c0_10 = arith.constant 0 : index
    %28 = vector.load %arg4[%c0_9, %c0_10] : memref<128x384xbf16, #tpu.memory_space<vmem>>, vector<128x384xbf16>
    %cst_11 = arith.constant dense<0.000000e+00> : vector<16x384xf32>
    %29 = tpu.matmul %27, %28, %cst_11 {dimension_numbers = #tpu.dot_dimension_numbers<[1], [0], [0], [1], [0, 0, 1, 1], [], []>} : vector<16x128xbf16>, vector<128x384xbf16>, vector<16x384xf32> -> vector<16x384xf32>
    %c0_12 = arith.constant 0 : index
    %c0_13 = arith.constant 0 : index
    %30 = vector.load %arg5[%c0_12, %c0_13] : memref<1x384xf32, #tpu.memory_space<vmem>>, vector<1x384xf32>
    %31 = vector.broadcast %30 : vector<1x384xf32> to vector<16x384xf32>
    %32 = arith.addf %29, %31 : vector<16x384xf32>
    %33 = vector.extract_strided_slice %32 {offsets = [0, 0], sizes = [16, 128], strides = [1, 1]} : vector<16x384xf32> to vector<16x128xf32>
    %34 = arith.truncf %33 : vector<16x128xf32> to vector<16x128xbf16>
    %35 = vector.extract_strided_slice %32 {offsets = [0, 128], sizes = [16, 128], strides = [1, 1]} : vector<16x384xf32> to vector<16x128xf32>
    %36 = arith.truncf %35 : vector<16x128xf32> to vector<16x128xbf16>
    %37 = vector.extract_strided_slice %32 {offsets = [0, 256], sizes = [16, 128], strides = [1, 1]} : vector<16x384xf32> to vector<16x128xf32>
    %38 = arith.truncf %37 : vector<16x128xf32> to vector<16x128xbf16>
    %39 = vector.extract_strided_slice %34 {offsets = [0, 0], sizes = [16, 32], strides = [1, 1]} : vector<16x128xbf16> to vector<16x32xbf16>
    %40 = vector.shape_cast %39 : vector<16x32xbf16> to vector<2x8x32xbf16>
    %41 = vector.extract_strided_slice %36 {offsets = [0, 0], sizes = [16, 32], strides = [1, 1]} : vector<16x128xbf16> to vector<16x32xbf16>
    %42 = vector.shape_cast %41 : vector<16x32xbf16> to vector<2x8x32xbf16>
    %43 = vector.extract_strided_slice %38 {offsets = [0, 0], sizes = [16, 32], strides = [1, 1]} : vector<16x128xbf16> to vector<16x32xbf16>
    %44 = vector.shape_cast %43 : vector<16x32xbf16> to vector<2x8x32xbf16>
    "tpu.trace_start"() <{level = 10 : i32, message = "bqe,bke->bqk"}> : () -> ()
    %cst_14 = arith.constant dense<0.000000e+00> : vector<2x8x8xf32>
    %45 = tpu.matmul %40, %42, %cst_14 {dimension_numbers = #tpu.dot_dimension_numbers<[2], [2], [1], [1], [0, 0, 0, 1, 1, 1], [0], [0]>} : vector<2x8x32xbf16>, vector<2x8x32xbf16>, vector<2x8x8xf32> -> vector<2x8x8xf32>
    "tpu.trace_stop"() : () -> ()
    %cst_15 = arith.constant dense<0xFF800000> : vector<2x8xf32>
    %46 = vector.multi_reduction <maximumf>, %45, %cst_15 [2] : vector<2x8x8xf32> to vector<2x8xf32>
    %47 = vector.shape_cast %46 : vector<2x8xf32> to vector<2x8x1xf32>
    %48 = vector.broadcast %47 : vector<2x8x1xf32> to vector<2x8x8xf32>
    %49 = arith.subf %45, %48 : vector<2x8x8xf32>
    %50 = math.exp %49 : vector<2x8x8xf32>
    %cst_16 = arith.constant dense<0.000000e+00> : vector<2x8xf32>
    %51 = vector.multi_reduction <add>, %50, %cst_16 [2] : vector<2x8x8xf32> to vector<2x8xf32>
    %52 = vector.shape_cast %51 : vector<2x8xf32> to vector<2x8x1xf32>
    %53 = tpu.reciprocal %52 {approx = true} : vector<2x8x1xf32> -> vector<2x8x1xf32>
    %54 = vector.broadcast %53 : vector<2x8x1xf32> to vector<2x8x8xf32>
    %55 = arith.mulf %50, %54 : vector<2x8x8xf32>
    %56 = arith.truncf %55 : vector<2x8x8xf32> to vector<2x8x8xbf16>
    "tpu.trace_start"() <{level = 10 : i32, message = "bqk,bke->bqe"}> : () -> ()
    %cst_17 = arith.constant dense<0.000000e+00> : vector<2x8x32xf32>
    %57 = tpu.matmul %56, %44, %cst_17 {dimension_numbers = #tpu.dot_dimension_numbers<[2], [1], [1], [2], [0, 0, 0, 1, 1, 2], [0], [0]>} : vector<2x8x8xbf16>, vector<2x8x32xbf16>, vector<2x8x32xf32> -> vector<2x8x32xf32>
    "tpu.trace_stop"() : () -> ()
    %58 = vector.shape_cast %57 : vector<2x8x32xf32> to vector<16x32xf32>
    %59 = vector.extract_strided_slice %34 {offsets = [0, 32], sizes = [16, 32], strides = [1, 1]} : vector<16x128xbf16> to vector<16x32xbf16>
    %60 = vector.shape_cast %59 : vector<16x32xbf16> to vector<2x8x32xbf16>
    %61 = vector.extract_strided_slice %36 {offsets = [0, 32], sizes = [16, 32], strides = [1, 1]} : vector<16x128xbf16> to vector<16x32xbf16>
    %62 = vector.shape_cast %61 : vector<16x32xbf16> to vector<2x8x32xbf16>
    %63 = vector.extract_strided_slice %38 {offsets = [0, 32], sizes = [16, 32], strides = [1, 1]} : vector<16x128xbf16> to vector<16x32xbf16>
    %64 = vector.shape_cast %63 : vector<16x32xbf16> to vector<2x8x32xbf16>
    "tpu.trace_start"() <{level = 10 : i32, message = "bqe,bke->bqk"}> : () -> ()
    %cst_18 = arith.constant dense<0.000000e+00> : vector<2x8x8xf32>
    %65 = tpu.matmul %60, %62, %cst_18 {dimension_numbers = #tpu.dot_dimension_numbers<[2], [2], [1], [1], [0, 0, 0, 1, 1, 1], [0], [0]>} : vector<2x8x32xbf16>, vector<2x8x32xbf16>, vector<2x8x8xf32> -> vector<2x8x8xf32>
    "tpu.trace_stop"() : () -> ()
    %cst_19 = arith.constant dense<0xFF800000> : vector<2x8xf32>
    %66 = vector.multi_reduction <maximumf>, %65, %cst_19 [2] : vector<2x8x8xf32> to vector<2x8xf32>
    %67 = vector.shape_cast %66 : vector<2x8xf32> to vector<2x8x1xf32>
    %68 = vector.broadcast %67 : vector<2x8x1xf32> to vector<2x8x8xf32>
    %69 = arith.subf %65, %68 : vector<2x8x8xf32>
    %70 = math.exp %69 : vector<2x8x8xf32>
    %cst_20 = arith.constant dense<0.000000e+00> : vector<2x8xf32>
    %71 = vector.multi_reduction <add>, %70, %cst_20 [2] : vector<2x8x8xf32> to vector<2x8xf32>
    %72 = vector.shape_cast %71 : vector<2x8xf32> to vector<2x8x1xf32>
    %73 = tpu.reciprocal %72 {approx = true} : vector<2x8x1xf32> -> vector<2x8x1xf32>
    %74 = vector.broadcast %73 : vector<2x8x1xf32> to vector<2x8x8xf32>
    %75 = arith.mulf %70, %74 : vector<2x8x8xf32>
    %76 = arith.truncf %75 : vector<2x8x8xf32> to vector<2x8x8xbf16>
    "tpu.trace_start"() <{level = 10 : i32, message = "bqk,bke->bqe"}> : () -> ()
    %cst_21 = arith.constant dense<0.000000e+00> : vector<2x8x32xf32>
    %77 = tpu.matmul %76, %64, %cst_21 {dimension_numbers = #tpu.dot_dimension_numbers<[2], [1], [1], [2], [0, 0, 0, 1, 1, 2], [0], [0]>} : vector<2x8x8xbf16>, vector<2x8x32xbf16>, vector<2x8x32xf32> -> vector<2x8x32xf32>
    "tpu.trace_stop"() : () -> ()
    %78 = vector.shape_cast %77 : vector<2x8x32xf32> to vector<16x32xf32>
    %79 = vector.extract_strided_slice %34 {offsets = [0, 64], sizes = [16, 32], strides = [1, 1]} : vector<16x128xbf16> to vector<16x32xbf16>
    %80 = vector.shape_cast %79 : vector<16x32xbf16> to vector<2x8x32xbf16>
    %81 = vector.extract_strided_slice %36 {offsets = [0, 64], sizes = [16, 32], strides = [1, 1]} : vector<16x128xbf16> to vector<16x32xbf16>
    %82 = vector.shape_cast %81 : vector<16x32xbf16> to vector<2x8x32xbf16>
    %83 = vector.extract_strided_slice %38 {offsets = [0, 64], sizes = [16, 32], strides = [1, 1]} : vector<16x128xbf16> to vector<16x32xbf16>
    %84 = vector.shape_cast %83 : vector<16x32xbf16> to vector<2x8x32xbf16>
    "tpu.trace_start"() <{level = 10 : i32, message = "bqe,bke->bqk"}> : () -> ()
    %cst_22 = arith.constant dense<0.000000e+00> : vector<2x8x8xf32>
    %85 = tpu.matmul %80, %82, %cst_22 {dimension_numbers = #tpu.dot_dimension_numbers<[2], [2], [1], [1], [0, 0, 0, 1, 1, 1], [0], [0]>} : vector<2x8x32xbf16>, vector<2x8x32xbf16>, vector<2x8x8xf32> -> vector<2x8x8xf32>
    "tpu.trace_stop"() : () -> ()
    %cst_23 = arith.constant dense<0xFF800000> : vector<2x8xf32>
    %86 = vector.multi_reduction <maximumf>, %85, %cst_23 [2] : vector<2x8x8xf32> to vector<2x8xf32>
    %87 = vector.shape_cast %86 : vector<2x8xf32> to vector<2x8x1xf32>
    %88 = vector.broadcast %87 : vector<2x8x1xf32> to vector<2x8x8xf32>
    %89 = arith.subf %85, %88 : vector<2x8x8xf32>
    %90 = math.exp %89 : vector<2x8x8xf32>
    %cst_24 = arith.constant dense<0.000000e+00> : vector<2x8xf32>
    %91 = vector.multi_reduction <add>, %90, %cst_24 [2] : vector<2x8x8xf32> to vector<2x8xf32>
    %92 = vector.shape_cast %91 : vector<2x8xf32> to vector<2x8x1xf32>
    %93 = tpu.reciprocal %92 {approx = true} : vector<2x8x1xf32> -> vector<2x8x1xf32>
    %94 = vector.broadcast %93 : vector<2x8x1xf32> to vector<2x8x8xf32>
    %95 = arith.mulf %90, %94 : vector<2x8x8xf32>
    %96 = arith.truncf %95 : vector<2x8x8xf32> to vector<2x8x8xbf16>
    "tpu.trace_start"() <{level = 10 : i32, message = "bqk,bke->bqe"}> : () -> ()
    %cst_25 = arith.constant dense<0.000000e+00> : vector<2x8x32xf32>
    %97 = tpu.matmul %96, %84, %cst_25 {dimension_numbers = #tpu.dot_dimension_numbers<[2], [1], [1], [2], [0, 0, 0, 1, 1, 2], [0], [0]>} : vector<2x8x8xbf16>, vector<2x8x32xbf16>, vector<2x8x32xf32> -> vector<2x8x32xf32>
    "tpu.trace_stop"() : () -> ()
    %98 = vector.shape_cast %97 : vector<2x8x32xf32> to vector<16x32xf32>
    %99 = vector.extract_strided_slice %34 {offsets = [0, 96], sizes = [16, 32], strides = [1, 1]} : vector<16x128xbf16> to vector<16x32xbf16>
    %100 = vector.shape_cast %99 : vector<16x32xbf16> to vector<2x8x32xbf16>
    %101 = vector.extract_strided_slice %36 {offsets = [0, 96], sizes = [16, 32], strides = [1, 1]} : vector<16x128xbf16> to vector<16x32xbf16>
    %102 = vector.shape_cast %101 : vector<16x32xbf16> to vector<2x8x32xbf16>
    %103 = vector.extract_strided_slice %38 {offsets = [0, 96], sizes = [16, 32], strides = [1, 1]} : vector<16x128xbf16> to vector<16x32xbf16>
    %104 = vector.shape_cast %103 : vector<16x32xbf16> to vector<2x8x32xbf16>
    "tpu.trace_start"() <{level = 10 : i32, message = "bqe,bke->bqk"}> : () -> ()
    %cst_26 = arith.constant dense<0.000000e+00> : vector<2x8x8xf32>
    %105 = tpu.matmul %100, %102, %cst_26 {dimension_numbers = #tpu.dot_dimension_numbers<[2], [2], [1], [1], [0, 0, 0, 1, 1, 1], [0], [0]>} : vector<2x8x32xbf16>, vector<2x8x32xbf16>, vector<2x8x8xf32> -> vector<2x8x8xf32>
    "tpu.trace_stop"() : () -> ()
    %cst_27 = arith.constant dense<0xFF800000> : vector<2x8xf32>
    %106 = vector.multi_reduction <maximumf>, %105, %cst_27 [2] : vector<2x8x8xf32> to vector<2x8xf32>
    %107 = vector.shape_cast %106 : vector<2x8xf32> to vector<2x8x1xf32>
    %108 = vector.broadcast %107 : vector<2x8x1xf32> to vector<2x8x8xf32>
    %109 = arith.subf %105, %108 : vector<2x8x8xf32>
    %110 = math.exp %109 : vector<2x8x8xf32>
    %cst_28 = arith.constant dense<0.000000e+00> : vector<2x8xf32>
    %111 = vector.multi_reduction <add>, %110, %cst_28 [2] : vector<2x8x8xf32> to vector<2x8xf32>
    %112 = vector.shape_cast %111 : vector<2x8xf32> to vector<2x8x1xf32>
    %113 = tpu.reciprocal %112 {approx = true} : vector<2x8x1xf32> -> vector<2x8x1xf32>
    %114 = vector.broadcast %113 : vector<2x8x1xf32> to vector<2x8x8xf32>
    %115 = arith.mulf %110, %114 : vector<2x8x8xf32>
    %116 = arith.truncf %115 : vector<2x8x8xf32> to vector<2x8x8xbf16>
    "tpu.trace_start"() <{level = 10 : i32, message = "bqk,bke->bqe"}> : () -> ()
    %cst_29 = arith.constant dense<0.000000e+00> : vector<2x8x32xf32>
    %117 = tpu.matmul %116, %104, %cst_29 {dimension_numbers = #tpu.dot_dimension_numbers<[2], [1], [1], [2], [0, 0, 0, 1, 1, 2], [0], [0]>} : vector<2x8x8xbf16>, vector<2x8x32xbf16>, vector<2x8x32xf32> -> vector<2x8x32xf32>
    "tpu.trace_stop"() : () -> ()
    %118 = vector.shape_cast %117 : vector<2x8x32xf32> to vector<16x32xf32>
    %119 = tpu.concatenate %58, %78, %98, %118 in 1 : vector<16x32xf32>, vector<16x32xf32>, vector<16x32xf32>, vector<16x32xf32> -> vector<16x128xf32>
    %120 = arith.truncf %119 : vector<16x128xf32> to vector<16x128xbf16>
    %c0_30 = arith.constant 0 : index
    %c0_31 = arith.constant 0 : index
    %121 = vector.load %arg6[%c0_30, %c0_31] : memref<128x128xbf16, #tpu.memory_space<vmem>>, vector<128x128xbf16>
    %cst_32 = arith.constant dense<0.000000e+00> : vector<16x128xf32>
    %122 = tpu.matmul %120, %121, %cst_32 {dimension_numbers = #tpu.dot_dimension_numbers<[1], [0], [0], [1], [0, 0, 1, 1], [], []>} : vector<16x128xbf16>, vector<128x128xbf16>, vector<16x128xf32> -> vector<16x128xf32>
    %c0_33 = arith.constant 0 : index
    %c0_34 = arith.constant 0 : index
    %123 = vector.load %arg7[%c0_33, %c0_34] : memref<1x128xf32, #tpu.memory_space<vmem>>, vector<1x128xf32>
    %124 = vector.broadcast %123 : vector<1x128xf32> to vector<16x128xf32>
    %125 = arith.addf %122, %124 : vector<16x128xf32>
    %126 = arith.addf %125, %0 : vector<16x128xf32>
    %cst_35 = arith.constant dense<0.000000e+00> : vector<16xf32>
    %127 = vector.multi_reduction <add>, %126, %cst_35 [1] : vector<16x128xf32> to vector<16xf32>
    %128 = vector.shape_cast %127 : vector<16xf32> to vector<16x1xf32>
    %cst_36 = arith.constant 1.280000e+02 : f32
    %129 = vector.broadcast %cst_36 : f32 to vector<16x1xf32>
    %130 = arith.divf %128, %129 : vector<16x1xf32>
    %131 = vector.broadcast %130 : vector<16x1xf32> to vector<16x128xf32>
    %132 = arith.subf %126, %131 : vector<16x128xf32>
    %133 = arith.mulf %132, %132 : vector<16x128xf32>
    %cst_37 = arith.constant dense<0.000000e+00> : vector<16xf32>
    %134 = vector.multi_reduction <add>, %133, %cst_37 [1] : vector<16x128xf32> to vector<16xf32>
    %135 = vector.shape_cast %134 : vector<16xf32> to vector<16x1xf32>
    %cst_38 = arith.constant 1.280000e+02 : f32
    %136 = vector.broadcast %cst_38 : f32 to vector<16x1xf32>
    %137 = arith.divf %135, %136 : vector<16x1xf32>
    %138 = vector.broadcast %130 : vector<16x1xf32> to vector<16x128xf32>
    %139 = arith.subf %126, %138 : vector<16x128xf32>
    %cst_39 = arith.constant 9.99999974E-6 : f32
    %140 = vector.broadcast %cst_39 : f32 to vector<16x1xf32>
    %141 = arith.addf %137, %140 : vector<16x1xf32>
    %142 = math.rsqrt %141 : vector<16x1xf32>
    %143 = vector.broadcast %142 : vector<16x1xf32> to vector<16x128xf32>
    %144 = arith.mulf %139, %143 : vector<16x128xf32>
    %145 = arith.mulf %144, %3 : vector<16x128xf32>
    %146 = arith.addf %145, %6 : vector<16x128xf32>
    %147 = arith.truncf %146 : vector<16x128xf32> to vector<16x128xbf16>
    %c0_40 = arith.constant 0 : index
    %c0_41 = arith.constant 0 : index
    %148 = vector.load %arg8[%c0_40, %c0_41] : memref<128x256xbf16, #tpu.memory_space<vmem>>, vector<128x256xbf16>
    %cst_42 = arith.constant dense<0.000000e+00> : vector<16x256xf32>
    %149 = tpu.matmul %147, %148, %cst_42 {dimension_numbers = #tpu.dot_dimension_numbers<[1], [0], [0], [1], [0, 0, 1, 1], [], []>} : vector<16x128xbf16>, vector<128x256xbf16>, vector<16x256xf32> -> vector<16x256xf32>
    %c0_43 = arith.constant 0 : index
    %c0_44 = arith.constant 0 : index
    %150 = vector.load %arg9[%c0_43, %c0_44] : memref<1x256xf32, #tpu.memory_space<vmem>>, vector<1x256xf32>
    %151 = vector.broadcast %150 : vector<1x256xf32> to vector<16x256xf32>
    %152 = arith.addf %149, %151 : vector<16x256xf32>
    %cst_45 = arith.constant 5.000000e-01 : f32
    %153 = vector.broadcast %cst_45 : f32 to vector<16x256xf32>
    %154 = arith.mulf %153, %152 : vector<16x256xf32>
    %cst_46 = arith.constant 0.707106769 : f32
    %155 = vector.broadcast %cst_46 : f32 to vector<16x256xf32>
    %156 = arith.mulf %152, %155 : vector<16x256xf32>
    %157 = math.erf %156 : vector<16x256xf32>
    %cst_47 = arith.constant 1.000000e+00 : f32
    %158 = vector.broadcast %cst_47 : f32 to vector<16x256xf32>
    %159 = arith.addf %158, %157 : vector<16x256xf32>
    %160 = arith.mulf %154, %159 : vector<16x256xf32>
    %161 = arith.truncf %160 : vector<16x256xf32> to vector<16x256xbf16>
    %c0_48 = arith.constant 0 : index
    %c0_49 = arith.constant 0 : index
    %162 = vector.load %arg10[%c0_48, %c0_49] : memref<256x128xbf16, #tpu.memory_space<vmem>>, vector<256x128xbf16>
    %cst_50 = arith.constant dense<0.000000e+00> : vector<16x128xf32>
    %163 = tpu.matmul %161, %162, %cst_50 {dimension_numbers = #tpu.dot_dimension_numbers<[1], [0], [0], [1], [0, 0, 1, 1], [], []>} : vector<16x256xbf16>, vector<256x128xbf16>, vector<16x128xf32> -> vector<16x128xf32>
    %c0_51 = arith.constant 0 : index
    %c0_52 = arith.constant 0 : index
    %164 = vector.load %arg11[%c0_51, %c0_52] : memref<1x128xf32, #tpu.memory_space<vmem>>, vector<1x128xf32>
    %165 = vector.broadcast %164 : vector<1x128xf32> to vector<16x128xf32>
    %166 = arith.addf %163, %165 : vector<16x128xf32>
    %167 = arith.addf %166, %126 : vector<16x128xf32>
    %c0_53 = arith.constant 0 : index
    %c0_54 = arith.constant 0 : index
    %168 = vector.load %arg12[%c0_53, %c0_54] : memref<16x128xf32, #tpu.memory_space<vmem>>, vector<16x128xf32>
    tpu.vector_store %arg12[%c0_53, %c0_54], %167 {strides = array<i32>} : memref<16x128xf32, #tpu.memory_space<vmem>>, vector<16x128xf32>,
    return
  }
  func.func @transform_0(%arg0: i32) -> (i32, i32) {
    %c0_i32 = arith.constant 0 : i32
    %c0_i32_0 = arith.constant 0 : i32
    %c0_i32_1 = arith.constant 0 : i32
    return %c0_i32, %c0_i32_0 : i32, i32
  }
  func.func @transform_1(%arg0: i32) -> (i32, i32) {
    %c0_i32 = arith.constant 0 : i32
    %c0_i32_0 = arith.constant 0 : i32
    %c0_i32_1 = arith.constant 0 : i32
    return %c0_i32, %c0_i32_0 : i32, i32
  }
  func.func @transform_2(%arg0: i32) -> (i32, i32) {
    %c0_i32 = arith.constant 0 : i32
    %c0_i32_0 = arith.constant 0 : i32
    %c0_i32_1 = arith.constant 0 : i32
    return %c0_i32, %c0_i32_0 : i32, i32
  }
  func.func @transform_3(%arg0: i32) -> (i32, i32) {
    %c0_i32 = arith.constant 0 : i32
    %c0_i32_0 = arith.constant 0 : i32
    %c0_i32_1 = arith.constant 0 : i32
    return %c0_i32, %c0_i32_0 : i32, i32
  }
  func.func @transform_4(%arg0: i32) -> (i32, i32) {
    %c0_i32 = arith.constant 0 : i32
    %c0_i32_0 = arith.constant 0 : i32
    %c0_i32_1 = arith.constant 0 : i32
    return %c0_i32, %c0_i32_0 : i32, i32
  }
  func.func @transform_5(%arg0: i32) -> (i32, i32) {
    %c0_i32 = arith.constant 0 : i32
    %c0_i32_0 = arith.constant 0 : i32
    %c0_i32_1 = arith.constant 0 : i32
    return %c0_i32, %c0_i32_0 : i32, i32
  }
  func.func @transform_6(%arg0: i32) -> (i32, i32) {
    %c0_i32 = arith.constant 0 : i32
    %c0_i32_0 = arith.constant 0 : i32
    %c0_i32_1 = arith.constant 0 : i32
    return %c0_i32, %c0_i32_0 : i32, i32
  }
  func.func @transform_7(%arg0: i32) -> (i32, i32) {
    %c0_i32 = arith.constant 0 : i32
    %c0_i32_0 = arith.constant 0 : i32
    %c0_i32_1 = arith.constant 0 : i32
    return %c0_i32, %c0_i32_0 : i32, i32
  }
  func.func @transform_8(%arg0: i32) -> (i32, i32) {
    %c0_i32 = arith.constant 0 : i32
    %c0_i32_0 = arith.constant 0 : i32
    %c0_i32_1 = arith.constant 0 : i32
    return %c0_i32, %c0_i32_0 : i32, i32
  }
  func.func @transform_9(%arg0: i32) -> (i32, i32) {
    %c0_i32 = arith.constant 0 : i32
    %c0_i32_0 = arith.constant 0 : i32
    %c0_i32_1 = arith.constant 0 : i32
    return %c0_i32, %c0_i32_0 : i32, i32
  }
  func.func @transform_10(%arg0: i32) -> (i32, i32) {
    %c0_i32 = arith.constant 0 : i32
    %c0_i32_0 = arith.constant 0 : i32
    %c0_i32_1 = arith.constant 0 : i32
    return %c0_i32, %c0_i32_0 : i32, i32
  }
  func.func @transform_11(%arg0: i32) -> (i32, i32) {
    %c0_i32 = arith.constant 0 : i32
    %c0_i32_0 = arith.constant 0 : i32
    %c0_i32_1 = arith.constant 0 : i32
    return %c0_i32, %c0_i32_0 : i32, i32
  }
}

</mosaic_0001>

<bundles_post_ra>
// kernel: transformer_encoder.1
= control target key start
LH: loop header
LB: loop body
LE: loop exit
PB: predicated region body
PF: predicated region fallthrough
CT: control target
= control target key end

     0   :  { %16 = vsyncpa [#allocation3], 0  ;;  %s2875_s0 = inlined_call_operand.hbm [shape: f32[16,128], index: 0, kind: input, shape index: {}]   ;;  %s2876_s1 = inlined_call_operand.vmem [shape: f32[1,128], index: 1, kind: input, shape index: {}]   ;;  %s2877_s2 = inlined_call_operand.vmem [shape: f32[1,128], index: 2, kind: input, shape index: {}]   ;;  %s2878_s3 = inlined_call_operand.hbm [shape: bf16[128,384], index: 3, kind: input, shape index: {}]   ;;  %s2879_s4 = inlined_call_operand.vmem [shape: f32[1,384], index: 4, kind: input, shape index: {}]   ;;  %s2880_s5 = inlined_call_operand.hbm [shape: bf16[128,128], index: 5, kind: input, shape index: {}]   ;;  %s2881_s6 = inlined_call_operand.vmem [shape: f32[1,128], index: 6, kind: input, shape index: {}]   ;;  %s2882_s7 = inlined_call_operand.hbm [shape: bf16[128,256], index: 7, kind: input, shape index: {}]   ;;  %s2883_s8 = inlined_call_operand.vmem [shape: f32[1,256], index: 8, kind: input, shape index: {}]   ;;  %s2884_s9 = inlined_call_operand.hbm [shape: bf16[256,128], index: 9, kind: input, shape index: {}]   ;;  %s2885_s10 = inlined_call_operand.vmem [shape: f32[1,128], index: 10, kind: input, shape index: {}]   ;;  %s2886_s11 = inlined_call_operand.hbm [shape: f32[16,128], index: 11, kind: output, shape index: {}]  }
   0x1   :  { %17 = vsyncpa [#allocation6], 0 }
   0x2   :  { %18 = vsyncpa [#allocation9], 0 }
   0x3   :  { %19 = vsyncpa [#allocation4], 0  ;;  %s2454_s17 = smov [#allocation5]   ;;  %s2314_s21 = scalar_lea.hbm %s2878_s3, 3072 }
   0x4   :  { %s41_s18 = sshll.u32 %s2454_s17, 4  ;;  %p2315_p0 = scmp.ne.s32.totalorder %s2878_s3, %s2314_s21  ;;  %s42_s18 = int_to_ptr.vmem [resolvable:$true] %s41_s18 }
   0x5   :  { %p2318_p1 = scmp.lt.u32.totalorder %s2314_s21, %s2878_s3 }
   0x7   :  { %p2320_p2 = pnand %p2318_p1, %p2315_p0 }
   0x9   :  { %2323 = shalt.err (!%p2320_p2)
}
   0xa   :  { %s2324_s26 = scalar_lea.vmem %s42_s18, 3072  ;;  %p2329_p4 = scmp.lt.s32.totalorder %s42_s18, %s42_s18 }
   0xb   :  { %p2325_p3 = scmp.ne.s32.totalorder %s42_s18, %s2324_s26  ;;  %p2330_p5 = scmp.lt.s32.totalorder %s2324_s26, %s2324_s26 }
   0xd   :  { %p2331_p6 = por %p2330_p5, %p2329_p4 }
   0xf   :  { %p2332_p7 = pnand %p2331_p6, %p2325_p3 }
  0x11   :  { %2335 = shalt.err (!%p2332_p7)
}
  0x12   :  { %s2455_s27 = smov 192   ;;  %s2456_s28 = smov 12  }
  0x13   :  { %47 = dma.hbm_to_vmem [thread:$0]  %s2878_s3, 3072, %s42_s18, [#allocation6], %s2455_s27, %s2455_s27, %s2456_s28  }
  0x14   :  { %s2457_s12 = smov [#allocation8]   ;;  %s2458_s14 = smov [#allocation2]  }
  0x15   :  { %s69_s13 = sshll.u32 %s2457_s12, 4  ;;  %s25_s15 = sshll.u32 %s2458_s14, 4  ;;  %s70_s13 = int_to_ptr.vmem [resolvable:$true] %s69_s13  ;;  %s26_s15 = int_to_ptr.vmem [resolvable:$true] %s25_s15 }
  0x16   :  { %s2336_s19 = scalar_lea.hbm %s2882_s7, 2048 }
  0x17   :  { %p2337_p8 = scmp.ne.s32.totalorder %s2882_s7, %s2336_s19  ;;  %p2340_p9 = scmp.lt.u32.totalorder %s2336_s19, %s2882_s7 }
  0x19   :  { %p2342_p10 = pnand %p2340_p9, %p2337_p8 }
  0x1b   :  { %2345 = shalt.err (!%p2342_p10)
}
  0x1c   :  { %s2346_s3 = scalar_lea.vmem %s70_s13, 2048  ;;  %p2351_p12 = scmp.lt.s32.totalorder %s70_s13, %s70_s13 }
  0x1d   :  { %p2347_p11 = scmp.ne.s32.totalorder %s70_s13, %s2346_s3  ;;  %p2352_p13 = scmp.lt.s32.totalorder %s2346_s3, %s2346_s3 }
  0x1f   :  { %p2353_p0 = por %p2352_p13, %p2351_p12 }
  0x21   :  { %p2354_p1 = pnand %p2353_p0, %p2347_p11 }
  0x23   :  { %2357 = shalt.err (!%p2354_p1)
}
  0x24   :  { %s2459_s18 = smov 128   ;;  %s2460_s24 = smov 8  }
  0x25   :  { %75 = dma.hbm_to_vmem [thread:$0]  %s2882_s7, 2048, %s70_s13, [#allocation9], %s2459_s18, %s2459_s18, %s2460_s24  }
  0x26   :  { %s2358_s29 = scalar_lea.hbm %s2875_s0, 256 }
  0x27   :  { %p2359_p2 = scmp.ne.s32.totalorder %s2875_s0, %s2358_s29  ;;  %p2362_p3 = scmp.lt.u32.totalorder %s2358_s29, %s2875_s0 }
  0x29   :  { %p2364_p4 = pnand %p2362_p3, %p2359_p2 }
  0x2b   :  { %2367 = shalt.err (!%p2364_p4)
}
  0x2c   :  { %s2368_s17 = scalar_lea.vmem %s26_s15, 256  ;;  %p2373_p6 = scmp.lt.s32.totalorder %s26_s15, %s26_s15 }
  0x2d   :  { %p2369_p5 = scmp.ne.s32.totalorder %s26_s15, %s2368_s17  ;;  %p2374_p7 = scmp.lt.s32.totalorder %s2368_s17, %s2368_s17 }
  0x2f   :  { %p2375_p8 = por %p2374_p7, %p2373_p6 }
  0x31   :  { %p2376_p9 = pnand %p2375_p8, %p2369_p5 }
  0x33   :  { %2379 = shalt.err (!%p2376_p9)
}
  0x34   :  { %31 = dma.hbm_to_vmem [thread:$0]  %s2875_s0, 256, %s26_s15, [#allocation3], %s2459_s18, %s2459_s18, %s2460_s24  }
  0x35   :  { %s2461_s19 = smov [#allocation7]   ;;  %s2380_s23 = scalar_lea.hbm %s2880_s5, 1024 }
  0x36   :  { %s55_s20 = sshll.u32 %s2461_s19, 4  ;;  %p2381_p10 = scmp.ne.s32.totalorder %s2880_s5, %s2380_s23  ;;  %s56_s20 = int_to_ptr.vmem [resolvable:$true] %s55_s20 }
  0x37   :  { %p2384_p11 = scmp.lt.u32.totalorder %s2380_s23, %s2880_s5 }
  0x39   :  { %p2386_p12 = pnand %p2384_p11, %p2381_p10 }
  0x3b   :  { %2389 = shalt.err (!%p2386_p12)
}
  0x3c   :  { %s2390_s28 = scalar_lea.vmem %s56_s20, 1024  ;;  %p2395_p0 = scmp.lt.s32.totalorder %s56_s20, %s56_s20 }
  0x3d   :  { %p2391_p13 = scmp.ne.s32.totalorder %s56_s20, %s2390_s28  ;;  %p2396_p1 = scmp.lt.s32.totalorder %s2390_s28, %s2390_s28 }
  0x3f   :  { %p2397_p2 = por %p2396_p1, %p2395_p0 }
  0x41   :  { %p2398_p3 = pnand %p2397_p2, %p2391_p13 }
  0x43   :  { %2401 = shalt.err (!%p2398_p3)
}
  0x44   :  { %s2462_s0 = smov 64   ;;  %s2463_s15 = smov 4  }
  0x45   :  { %61 = dma.hbm_to_vmem [thread:$0]  %s2880_s5, 1024, %s56_s20, [#allocation6], %s2462_s0, %s2462_s0, %s2463_s15  }
  0x46   :  { %s2464_s12 = smov [#allocation10]   ;;  %s2402_s7 = scalar_lea.hbm %s2884_s9, 2048 }
  0x47   :  { %s83_s14 = sshll.u32 %s2464_s12, 4  ;;  %p2403_p4 = scmp.ne.s32.totalorder %s2884_s9, %s2402_s7  ;;  %s84_s14 = int_to_ptr.vmem [resolvable:$true] %s83_s14 }
  0x48   :  { %p2406_p5 = scmp.lt.u32.totalorder %s2402_s7, %s2884_s9 }
  0x4a   :  { %p2408_p6 = pnand %p2406_p5, %p2403_p4 }
  0x4c   :  { %2411 = shalt.err (!%p2408_p6)
}
  0x4d   :  { %s2412_s23 = scalar_lea.vmem %s84_s14, 2048  ;;  %p2417_p8 = scmp.lt.s32.totalorder %s84_s14, %s84_s14 }
  0x4e   :  { %p2413_p7 = scmp.ne.s32.totalorder %s84_s14, %s2412_s23  ;;  %p2418_p9 = scmp.lt.s32.totalorder %s2412_s23, %s2412_s23 }
  0x50   :  { %p2419_p10 = por %p2418_p9, %p2417_p8 }
  0x52   :  { %p2420_p11 = pnand %p2419_p10, %p2413_p7 }
  0x54   :  { %2423 = shalt.err (!%p2420_p11)
}
  0x55   :  { %89 = dma.hbm_to_vmem [thread:$0]  %s2884_s9, 2048, %s84_s14, [#allocation9], %s2462_s0, %s2462_s0, %s2463_s15  }
  0x56   :  { %2446 = dma.done.wait [#allocation3], 256  }
  0x57   :  { %2447 = vsyncadd [#allocation3], 4294967040 }
  0x58   :  { %2448 = dma.done.wait [#allocation6], 4096  }
  0x59   :  { %2449 = vsyncadd [#allocation6], 4294963200 }
  0x5a   :  { %2450 = dma.done.wait [#allocation9], 4096  }
  0x5b   :  { %2451 = vsyncadd [#allocation9], 4294963200  ;;  %v108_v0 = vld [vmem:[#allocation2] sm:$0xff]  ;;  %v109_v1 = vld [vmem:[#allocation2 + $0x8] sm:$0xff]  ;;  %v2465_v4 = vmov 0.0   ;;  %v2466_v30 = vmov 0   ;;  %v186_v53 = vlaneseq }
  0x5c   :  { %124 = vadd.xlane.f32.xlu0 %v108_v0  ;;  %v2184_v2 = vld [vmem:[#allocation5 + $0x4] ss:$12 sps:$4 sm:$0xff]   ;;  %v2186_v3 = vld [vmem:[#allocation5] ss:$12 sps:$4 sm:$0xff]   ;;  %2016 = vmatprep.subr.bf16.mxu1 %v2465_v4  ;;  %v2187_v5 = vld [vmem:[#allocation5 + $0x8] ss:$12 sps:$4 sm:$0xff]  }
  0x5d   :  { %v2188_v6 = vld [vmem:[#allocation5 + $0x1c] ss:$12 sps:$4 sm:$0xff]   ;;  %329 = vmatprep.subr.bf16.mxu0 %v2184_v2  ;;  %2017 = vmatpush3.bf16.msra.mxu1 %v2187_v5  ;;  %v2190_v15 = vld [vmem:[#allocation5 + $0x18] ss:$12 sps:$4 sm:$0xff]   ;;  %v2191_v16 = vld [vmem:[#allocation5 + $0x20] ss:$12 sps:$4 sm:$0xff]  }
  0x5e   :  { %330 = vmatpush1.bf16.msra.mxu0 %v2186_v3  ;;  %2018 = vmatprep.subr.bf16.mxu1 %v2465_v4  ;;  %v2192_v17 = vld [vmem:[#allocation5 + $0x34] ss:$12 sps:$4 sm:$0xff]   ;;  %v2194_v18 = vld [vmem:[#allocation5 + $0x30] ss:$12 sps:$4 sm:$0xff]   ;;  %v2195_v19 = vld [vmem:[#allocation5 + $0x38] ss:$12 sps:$4 sm:$0xff]  }
  0x5f   :  { %331 = vmatprep.subr.bf16.mxu0 %v2188_v6  ;;  %v2196_v20 = vld [vmem:[#allocation5 + $0x4c] ss:$12 sps:$4 sm:$0xff]   ;;  %v2198_v21 = vld [vmem:[#allocation5 + $0x48] ss:$12 sps:$4 sm:$0xff]   ;;  %v2199_v22 = vld [vmem:[#allocation5 + $0x50] ss:$12 sps:$4 sm:$0xff]   ;;  %361 = vmatprep.mubr.bf16.mxu0 %v2466_v30 }
  0x60   :  { %126 = vadd.xlane.f32.xlu0 %v109_v1  ;;  %v2200_v23 = vld [vmem:[#allocation5 + $0x64] ss:$12 sps:$4 sm:$0xff]   ;;  %v2202_v24 = vld [vmem:[#allocation5 + $0x60] ss:$12 sps:$4 sm:$0xff]   ;;  %v2203_v25 = vld [vmem:[#allocation5 + $0x68] ss:$12 sps:$4 sm:$0xff]  }
  0x61   :  { %2019 = vmatpush3.bf16.msra.mxu1 %v2191_v16  ;;  %v2204_v26 = vld [vmem:[#allocation5 + $0x7c] ss:$12 sps:$4 sm:$0xff]   ;;  %v2206_v27 = vld [vmem:[#allocation5 + $0x78] ss:$12 sps:$4 sm:$0xff]   ;;  %v2207_v28 = vld [vmem:[#allocation5 + $0x80] ss:$12 sps:$4 sm:$0xff]  }
  0x62   :  { %332 = vmatpush1.bf16.msra.mxu0 %v2190_v15  ;;  %2020 = vmatprep.subr.bf16.mxu1 %v2465_v4  ;;  %v2208_v29 = vld [vmem:[#allocation5 + $0x94] ss:$12 sps:$4 sm:$0xff]   ;;  %vm2467_vm0 = vmmov 0   ;;  %v2210_v31 = vld [vmem:[#allocation5 + $0x90] ss:$12 sps:$4 sm:$0xff]   ;;  %v2642_v54 = vshrl.u32 %v186_v53, 7 }
  0x63   :  { %333 = vmatprep.subr.bf16.mxu0 %v2192_v17  ;;  %2032 = vmatprep.mubr.msk.bf16.mxu1 %vm2467_vm0, %v2465_v4  ;;  %v2211_v32 = vld [vmem:[#allocation5 + $0x98] ss:$12 sps:$4 sm:$0xff]   ;;  %v2214_v34 = vld [vmem:[#allocation5 + $0xa8] ss:$12 sps:$4 sm:$0xff]   ;;  %v2215_v35 = vld [vmem:[#allocation5 + $0xb0] ss:$12 sps:$4 sm:$0xff]  }
  0x64   :  { %v2212_v33 = vld [vmem:[#allocation5 + $0xac] ss:$12 sps:$4 sm:$0xff]   ;;  %v2626_v44 = vld [vmem:[%s2876_s1] ss:$0 sm:$0xff]  ;;  %v192_v55 = vsub.s32 1, %v2642_v54  ;;  %v196_v57 = vsub.s32 2, %v2642_v54 }
  0x65   :  { %2021 = vmatpush3.bf16.msra.mxu1 %v2195_v19  ;;  %v2633_v48 = vld [vmem:[%s2877_s2] ss:$0 sm:$0xff]  ;;  %v188_v59 = vsub.s32 0, %v2642_v54  ;;  %vm431_vm1 = vcmask 261120   ;;  %vm552_vm2 = vcmask 1043456   ;;  %vm524_vm3 = vcmask 64512  }
  0x66   :  { %334 = vmatpush1.bf16.msra.mxu0 %v2194_v18  ;;  %2022 = vmatprep.subr.bf16.mxu1 %v2465_v4  ;;  %v184_v56 = vld [vmem:[%s2879_s4] sm:$0x7]  ;;  %s2468_s4 = smov 96   ;;  %s2469_s27 = smov 32   ;;  %vm1328_vm4 = vcmask 523264   ;;  %vm1331_vm5 = vcmask 785408  }
  0x67   :  { %335 = vmatprep.subr.bf16.mxu0 %v2196_v20  ;;  %v193_v58 = vrot.slane %v184_v56, %v192_v55  ;;  %v197_v62 = vrot.slane %v184_v56, %v196_v57  ;;  %s2470_s30 = smov [#allocation11]  }
  0x68   :  { %s1834_s12 = sshll.u32 %s2470_s30, 4  ;;  %s1835_s12 = int_to_ptr.vmem [resolvable:$true] %s1834_s12 }
  0x69   :  { %2023 = vmatpush3.bf16.msra.mxu1 %v2199_v22  ;;  %s2424_s14 = scalar_lea.vmem %s1835_s12, 256  ;;  %p2429_p13 = scmp.lt.s32.totalorder %s1835_s12, %s1835_s12 }
  0x6a   :  { %336 = vmatpush1.bf16.msra.mxu0 %v2198_v21  ;;  %2024 = vmatprep.subr.bf16.mxu1 %v2465_v4  ;;  %p2425_p12 = scmp.ne.s32.totalorder %s1835_s12, %s2424_s14  ;;  %p2430_p0 = scmp.lt.s32.totalorder %s2424_s14, %s2424_s14 }
  0x6b   :  { %337 = vmatprep.subr.bf16.mxu0 %v2200_v23 }
  0x6c   :  { %p2431_p1 = por %p2430_p0, %p2429_p13 }
  0x6d   :  { %2025 = vmatpush3.bf16.msra.mxu1 %v2203_v25 }
  0x6e   :  { %338 = vmatpush1.bf16.msra.mxu0 %v2202_v24  ;;  %2026 = vmatprep.subr.bf16.mxu1 %v2465_v4  ;;  %p2432_p2 = pnand %p2431_p1, %p2425_p12 }
  0x6f   :  { %339 = vmatprep.subr.bf16.mxu0 %v2204_v26 }
  0x71   :  { %2027 = vmatpush3.bf16.msra.mxu1 %v2207_v28 }
  0x72   :  { %340 = vmatpush1.bf16.msra.mxu0 %v2206_v27  ;;  %2028 = vmatprep.subr.bf16.mxu1 %v2465_v4 }
  0x73   :  { %341 = vmatprep.subr.bf16.mxu0 %v2208_v29 }
  0x75   :  { %2029 = vmatpush3.bf16.msra.mxu1 %v2211_v32 }
  0x76   :  { %342 = vmatpush1.bf16.msra.mxu0 %v2210_v31  ;;  %2030 = vmatprep.subr.bf16.mxu1 %v2465_v4 }
  0x77   :  { %343 = vmatprep.subr.bf16.mxu0 %v2212_v33 }
  0x79   :  { %2031 = vmatpush3.bf16.msra.mxu1 %v2215_v35 }
  0x7a   :  { %344 = vmatpush1.bf16.msra.mxu0 %v2214_v34  ;;  %2036 = vmatprep.subr.bf16.mxu1 %v2465_v4 }
  0x7b   :  { %2060 = vmatprep.subr.bf16.mxu0 %v2465_v4 }
  0xe9   :  { %v125_v7 = vpop.xlane.xlu0 %124 }
  0xea   :  { %v129_v8 = vmul.f32 0.0078125, %v125_v7 }
  0xec   :  { %v2603_v9 = vsub.f32 %v108_v0, %v129_v8  ;;  %v189_v8 = vrot.slane %v184_v56, %v188_v59 }
  0xed   :  { %v127_v10 = vpop.xlane.xlu0 %126 }
  0xee   :  { %v130_v11 = vmul.f32 0.0078125, %v127_v10  ;;  %v133_v12 = vmul.f32 %v2603_v9, %v2603_v9 }
  0xf0   :  { %v2607_v13 = vsub.f32 %v109_v1, %v130_v11  ;;  %135 = vadd.xlane.f32.xlu1 %v133_v12 }
  0xf2   :  { %v134_v14 = vmul.f32 %v2607_v13, %v2607_v13 }
  0xf4   :  { %137 = vadd.xlane.f32.xlu1 %v134_v14 }
 0x17d   :  { %v136_v36 = vpop.xlane.xlu1 %135 }
 0x17e   :  { %v139_v37 = vmul.f32 0.0078125, %v136_v36 }
 0x180   :  { %v141_v38 = vadd.f32 1e-05, %v139_v37 }
 0x181   :  { %v138_v39 = vpop.xlane.xlu1 %137 }
 0x182   :  { %2264 = vrsqrt.f32 %v141_v38  ;;  %v140_v40 = vmul.f32 0.0078125, %v138_v39 }
 0x184   :  { %v142_v41 = vadd.f32 1e-05, %v140_v40 }
 0x186   :  { %2266 = vrsqrt.f32 %v142_v41 }
 0x18c   :  { %v2265_v42 = vpop.eup %2264 }
 0x18d   :  { %v145_v43 = vmul.f32 %v2265_v42, %v2603_v9 }
 0x18f   :  { %v147_v47 = vmul.f32 %v2626_v44, %v145_v43 }
 0x190   :  { %v2267_v45 = vpop.eup %2266 }
 0x191   :  { %v146_v46 = vmul.f32 %v2267_v45, %v2607_v13  ;;  %v149_v50 = vadd.f32 %v2633_v48, %v147_v47 }
 0x193   :  { %v148_v49 = vmul.f32 %v2626_v44, %v146_v46 }
 0x195   :  { %v150_v51 = vadd.f32 %v2633_v48, %v148_v49 }
 0x197   :  { %v151_v52 = vpack.c.bf16 %v150_v51, %v149_v50 }
 0x199   :  { %362 = vmatmul.mubr.bf16.vlgmr.msra.gmra.mrb[0].mxu0 %v151_v52  ;;  %2033 = vmatmul.mubr.bf16.vlgmr.msra.gmra.mrb[0].mxu1 %v151_v52 }
 0x19a   :  { %2038 = vmatprep.mubr.msk.bf16.mxu1 %vm2467_vm0, %v2465_v4  ;;  %2062 = vmatprep.mubr.msk.bf16.mxu0 %vm2467_vm0, %v2465_v4 }
 0x26c   :  { %v363_v60 = vpop.f32.mrb[0].mxu0  ;;  %v406_v61 = vpop.f32.mrb[0].mxu1 }
 0x26d   :  { %v365_v63 = vpop.f32.mrb[1].mxu0  ;;  %v2034_v0 = vpop.f32.mrb[1].mxu1  ;;  %v364_v12 = vadd.f32 %v363_v60, %v189_v8  ;;  %v407_v15 = vadd.f32 %v406_v61, %v197_v62 }
 0x26e   :  { %v366_v1 = vadd.f32 %v365_v63, %v193_v58  ;;  %v367_v2 = vpop.f32.mrb[2].mxu0  ;;  %v409_v3 = vpop.f32.mrb[2].mxu1 }
 0x26f   :  { %v2652_v5 = vadd.f32 %v409_v3, %v197_v62  ;;  %v369_v6 = vpop.f32.mrb[3].mxu0  ;;  %v2035_v7 = vpop.f32.mrb[3].mxu1  ;;  %v2663_v14 = vpack.c.bf16 %v364_v12, %v364_v12  ;;  %v368_v17 = vadd.f32 %v367_v2, %v189_v8  ;;  %v2672_v18 = vpack.c.bf16 %v407_v15, %v407_v15 }
 0x270   :  { %v2656_v9 = vpack.c.bf16 %v366_v1, %v366_v1  ;;  %v370_v10 = vadd.f32 %v369_v6, %v193_v58 }
 0x271   :  { %v2674_v19 = vpack.c.bf16 %v368_v17, %v368_v17  ;;  %v554_v20 = vsel %vm552_vm2, %v2672_v18, 0  ;;  %v2699_v50 = vpack.c.bf16 %v2652_v5, %v2652_v5 }
 0x272   :  { %v436_v11 = vsel %vm431_vm1, %v2656_v9, 0  ;;  %v2661_v13 = vpack.c.bf16 %v370_v10, %v370_v10 }
 0x273   :  { %2037 = vmatpush3.bf16.xpose.msra.mxu1 %v436_v11  ;;  %v600_v56 = vsel %vm552_vm2, %v2699_v50, 0 }
 0x274   :  { %2042 = vmatprep.subr.bf16.mxu1 %v2465_v4  ;;  %v482_v16 = vsel %vm431_vm1, %v2661_v13, 0 }
 0x27a   :  { %2039 = vmatmul.mubr.msk.bf16.vlgmr.msra.gmra.mrb[4].mxu1 %vm431_vm1, %v2663_v14 }
 0x27b   :  { %2043 = vmatpush3.bf16.xpose.msra.mxu1 %v482_v16  ;;  %2044 = vmatprep.mubr.msk.bf16.mxu1 %vm2467_vm0, %v2465_v4 }
 0x27c   :  { %2048 = vmatprep.subr.bf16.mxu1 %v2465_v4 }
 0x282   :  { %2045 = vmatmul.mubr.msk.bf16.vlgmr.msra.gmra.mrb[8].mxu1 %vm431_vm1, %v2674_v19 }
 0x283   :  { %2049 = vmatpush3.bf16.msra.mxu1 %v554_v20  ;;  %2050 = vmatprep.mubr.msk.bf16.mxu1 %vm2467_vm0, %v2465_v4 }
 0x284   :  { %2054 = vmatprep.subr.bf16.mxu1 %v2465_v4 }
 0x34d   :  { %v472_v21 = vpop.f32.mrb[4].mxu1 }
 0x34e   :  { %v2040_v22 = vpop.f32.mrb[5].mxu1  ;;  %v525_v23 = vsel %vm524_vm3, %v472_v21, -inf }
 0x34f   :  { %526 = vmax.xlane.f32.xlu0 %v525_v23  ;;  %v475_v24 = vpop.f32.mrb[6].mxu1 }
 0x350   :  { %v2041_v25 = vpop.f32.mrb[7].mxu1 }
 0x355   :  { %v518_v26 = vpop.f32.mrb[8].mxu1 }
 0x356   :  { %v2046_v27 = vpop.f32.mrb[9].mxu1  ;;  %v528_v28 = vsel %vm524_vm3, %v518_v26, -inf }
 0x357   :  { %529 = vmax.xlane.f32.xlu1 %v528_v28  ;;  %v521_v29 = vpop.f32.mrb[10].mxu1 }
 0x358   :  { %v2047_v31 = vpop.f32.mrb[11].mxu1 }
 0x368   :  { %694 = vrot.lane.b32.xlu1 %v2661_v13, %s2468_s4 }
 0x3dc   :  { %v527_v32 = vpop.xlane.xlu0 %526 }
 0x3dd   :  { %v531_v33 = vsub.f32 %v472_v21, %v527_v32 }
 0x3df   :  { %v533_v34 = vmul.f32 1.442695, %v531_v33 }
 0x3e1   :  { %2268 = vpow2.f32 %v533_v34 }
 0x3e4   :  { %v530_v35 = vpop.xlane.xlu1 %529 }
 0x3e5   :  { %v532_v36 = vsub.f32 %v518_v26, %v530_v35 }
 0x3e7   :  { %v535_v37 = vmul.f32 1.442695, %v532_v36 }
 0x3e8   :  { %v695_v43 = vpop.permute.xlu1 %694 }
 0x3e9   :  { %2270 = vpow2.f32 %v535_v37  ;;  %v700_v61 = vsel %vm431_vm1, %v695_v43, 0 }
 0x3eb   :  { %v2269_v38 = vpop.eup %2268 }
 0x3ec   :  { %v537_v39 = vsel %vm524_vm3, %v2269_v38, 0.0 }
 0x3ed   :  { %538 = vadd.xlane.f32.xlu0 %v537_v39 }
 0x3f3   :  { %v2271_v40 = vpop.eup %2270 }
 0x3f4   :  { %v540_v41 = vsel %vm524_vm3, %v2271_v40, 0.0 }
 0x3f5   :  { %541 = vadd.xlane.f32.xlu1 %v540_v41 }
 0x403   :  { %644 = vrot.lane.b32.xlu0 %v2656_v9, %s2468_s4 }
 0x406   :  { %642 = vrot.lane.b32.xlu1 %v2663_v14, %s2468_s4 }
 0x40a   :  { %692 = vrot.lane.b32.xlu1 %v2674_v19, %s2468_s4 }
 0x47a   :  { %v539_v42 = vpop.xlane.xlu0 %538 }
 0x47b   :  { %2272 = vrcp.f32 %v539_v42 }
 0x47e   :  { %v645_v45 = vpop.permute.xlu0 %644 }
 0x47f   :  { %v650_v46 = vsel %vm431_vm1, %v645_v45, 0 }
 0x480   :  { %2061 = vmatpush3.bf16.xpose.msra.mxu0 %v650_v46 }
 0x481   :  { %2072 = vmatprep.subr.bf16.mxu0 %v2465_v4 }
 0x482   :  { %v542_v47 = vpop.xlane.xlu1 %541 }
 0x483   :  { %2274 = vrcp.f32 %v542_v47 }
 0x485   :  { %v2273_v49 = vpop.eup %2272 }
 0x486   :  { %v545_v51 = vmul.f32 %v2273_v49, %v2269_v38  ;;  %v643_v52 = vpop.permute.xlu1 %642 }
 0x487   :  { %2063 = vmatmul.mubr.msk.bf16.vlgmr.msra.gmra.mrb[4].mxu0 %vm431_vm1, %v643_v52 }
 0x488   :  { %v547_v53 = vpack.c.bf16 %v545_v51, %v545_v51  ;;  %2074 = vmatprep.mubr.msk.bf16.mxu0 %vm2467_vm0, %v2465_v4 }
 0x48a   :  { %2051 = vmatmul.mubr.msk.bf16.vlgmr.msra.gmra.mrb[12].mxu1 %vm524_vm3, %v547_v53  ;;  %v693_v62 = vpop.permute.xlu1 %692 }
 0x48b   :  { %2055 = vmatpush3.bf16.msra.mxu1 %v600_v56  ;;  %2056 = vmatprep.mubr.msk.bf16.mxu1 %vm2467_vm0, %v2465_v4 }
 0x48c   :  { %2066 = vmatprep.subr.bf16.mxu1 %v2465_v4 }
 0x48d   :  { %v2275_v57 = vpop.eup %2274 }
 0x48e   :  { %v546_v58 = vmul.f32 %v2275_v57, %v2271_v40 }
 0x490   :  { %v548_v60 = vpack.c.bf16 %v546_v58, %v546_v58 }
 0x492   :  { %2057 = vmatmul.mubr.msk.bf16.vlgmr.msra.gmra.mrb[16].mxu1 %vm524_vm3, %v548_v60 }
 0x493   :  { %2068 = vmatprep.mubr.msk.bf16.mxu1 %vm2467_vm0, %v2465_v4 }
 0x494   :  { %2067 = vmatpush3.bf16.xpose.msra.mxu1 %v700_v61 }
 0x495   :  { %2078 = vmatprep.subr.bf16.mxu1 %v2465_v4 }
 0x49b   :  { %2069 = vmatmul.mubr.msk.bf16.vlgmr.msra.gmra.mrb[20].mxu1 %vm431_vm1, %v693_v62 }
 0x49c   :  { %2080 = vmatprep.mubr.msk.bf16.mxu1 %vm2467_vm0, %v2465_v4 }
 0x55a   :  { %v686_v63 = vpop.f32.mrb[4].mxu0 }
 0x55b   :  { %v2064_v0 = vpop.f32.mrb[5].mxu0  ;;  %v742_v1 = vsel %vm524_vm3, %v686_v63, -inf }
 0x55c   :  { %743 = vmax.xlane.f32.xlu0 %v742_v1  ;;  %v689_v2 = vpop.f32.mrb[6].mxu0 }
 0x55d   :  { %v2719_v3 = vpop.f32.mrb[12].mxu1  ;;  %v2065_v5 = vpop.f32.mrb[7].mxu0 }
 0x55e   :  { %v2052_v6 = vpop.f32.mrb[13].mxu1 }
 0x55f   :  { %v593_v7 = vpop.f32.mrb[14].mxu1 }
 0x560   :  { %v2053_v8 = vpop.f32.mrb[15].mxu1 }
 0x565   :  { %v2721_v10 = vpop.f32.mrb[16].mxu1 }
 0x566   :  { %v2058_v11 = vpop.f32.mrb[17].mxu1 }
 0x567   :  { %v639_v12 = vpop.f32.mrb[18].mxu1 }
 0x568   :  { %v2059_v15 = vpop.f32.mrb[19].mxu1 }
 0x56e   :  { %v736_v16 = vpop.f32.mrb[20].mxu1 }
 0x56f   :  { %v2070_v17 = vpop.f32.mrb[21].mxu1  ;;  %v745_v20 = vsel %vm524_vm3, %v736_v16, -inf }
 0x570   :  { %746 = vmax.xlane.f32.xlu1 %v745_v20  ;;  %v739_v21 = vpop.f32.mrb[22].mxu1 }
 0x571   :  { %v2071_v22 = vpop.f32.mrb[23].mxu1 }
 0x581   :  { %814 = vrot.lane.b32.xlu1 %v2699_v50, %s2468_s4 }
 0x585   :  { %864 = vrot.lane.b32.xlu1 %v2656_v9, %s2462_s0 }
 0x589   :  { %914 = vrot.lane.b32.xlu1 %v2661_v13, %s2462_s0 }
 0x58d   :  { %912 = vrot.lane.b32.xlu1 %v2674_v19, %s2462_s0 }
 0x5e9   :  { %v744_v23 = vpop.xlane.xlu0 %743 }
 0x5ea   :  { %v748_v24 = vsub.f32 %v686_v63, %v744_v23 }
 0x5ec   :  { %v750_v25 = vmul.f32 1.442695, %v748_v24 }
 0x5ee   :  { %2276 = vpow2.f32 %v750_v25 }
 0x5f8   :  { %v2277_v26 = vpop.eup %2276 }
 0x5f9   :  { %v754_v27 = vsel %vm524_vm3, %v2277_v26, 0.0 }
 0x5fa   :  { %755 = vadd.xlane.f32.xlu0 %v754_v27 }
 0x5fd   :  { %v747_v28 = vpop.xlane.xlu1 %746 }
 0x5fe   :  { %v749_v29 = vsub.f32 %v736_v16, %v747_v28 }
 0x600   :  { %v752_v31 = vmul.f32 1.442695, %v749_v29 }
 0x601   :  { %v815_v32 = vpop.permute.xlu1 %814 }
 0x602   :  { %2278 = vpow2.f32 %v752_v31  ;;  %v820_v33 = vsel %vm552_vm2, %v815_v32, 0 }
 0x603   :  { %2079 = vmatpush3.bf16.msra.mxu1 %v820_v33 }
 0x604   :  { %2090 = vmatprep.subr.bf16.mxu1 %v2465_v4 }
 0x605   :  { %v865_v42 = vpop.permute.xlu1 %864 }
 0x606   :  { %v870_v49 = vsel %vm431_vm1, %v865_v42, 0 }
 0x609   :  { %v915_v47 = vpop.permute.xlu1 %914 }
 0x60a   :  { %v920_v52 = vsel %vm431_vm1, %v915_v47, 0 }
 0x60c   :  { %v2279_v34 = vpop.eup %2278 }
 0x60d   :  { %v757_v35 = vsel %vm524_vm3, %v2279_v34, 0.0  ;;  %v913_v56 = vpop.permute.xlu1 %912 }
 0x60e   :  { %758 = vadd.xlane.f32.xlu0 %v757_v35 }
 0x624   :  { %766 = vrot.lane.b32.xlu0 %v2672_v18, %s2468_s4 }
 0x628   :  { %862 = vrot.lane.b32.xlu0 %v2663_v14, %s2462_s0 }
 0x687   :  { %v756_v36 = vpop.xlane.xlu0 %755 }
 0x688   :  { %2280 = vrcp.f32 %v756_v36 }
 0x692   :  { %v2281_v37 = vpop.eup %2280 }
 0x693   :  { %v762_v39 = vmul.f32 %v2281_v37, %v2277_v26 }
 0x695   :  { %v764_v43 = vpack.c.bf16 %v762_v39, %v762_v39 }
 0x69b   :  { %v759_v38 = vpop.xlane.xlu0 %758 }
 0x69c   :  { %2282 = vrcp.f32 %v759_v38 }
 0x69f   :  { %v767_v40 = vpop.permute.xlu0 %766 }
 0x6a0   :  { %v772_v41 = vsel %vm552_vm2, %v767_v40, 0 }
 0x6a1   :  { %2073 = vmatpush3.bf16.msra.mxu0 %v772_v41 }
 0x6a2   :  { %2084 = vmatprep.subr.bf16.mxu0 %v2465_v4 }
 0x6a3   :  { %v863_v53 = vpop.permute.xlu0 %862 }
 0x6a4   :  { %2075 = vmatmul.mubr.msk.bf16.vlgmr.msra.gmra.mrb[8].mxu0 %vm524_vm3, %v764_v43 }
 0x6a5   :  { %2086 = vmatprep.mubr.msk.bf16.mxu0 %vm2467_vm0, %v2465_v4 }
 0x6a6   :  { %v2283_v45 = vpop.eup %2282 }
 0x6a7   :  { %v763_v46 = vmul.f32 %v2283_v45, %v2279_v34 }
 0x6a9   :  { %v765_v51 = vpack.c.bf16 %v763_v46, %v763_v46 }
 0x6aa   :  { %2085 = vmatpush3.bf16.xpose.msra.mxu0 %v870_v49 }
 0x6ab   :  { %2081 = vmatmul.mubr.msk.bf16.vlgmr.msra.gmra.mrb[24].mxu1 %vm524_vm3, %v765_v51  ;;  %2096 = vmatprep.subr.bf16.mxu0 %v2465_v4 }
 0x6ac   :  { %2091 = vmatpush3.bf16.xpose.msra.mxu1 %v920_v52  ;;  %2092 = vmatprep.mubr.msk.bf16.mxu1 %vm2467_vm0, %v2465_v4 }
 0x6ad   :  { %2102 = vmatprep.subr.bf16.mxu1 %v2465_v4 }
 0x6b1   :  { %2087 = vmatmul.mubr.msk.bf16.vlgmr.msra.gmra.mrb[12].mxu0 %vm431_vm1, %v863_v53 }
 0x6b2   :  { %2098 = vmatprep.mubr.msk.bf16.mxu0 %vm2467_vm0, %v2465_v4 }
 0x6b3   :  { %2093 = vmatmul.mubr.msk.bf16.vlgmr.msra.gmra.mrb[28].mxu1 %vm431_vm1, %v913_v56 }
 0x6b4   :  { %2104 = vmatprep.mubr.msk.bf16.mxu1 %vm2467_vm0, %v2465_v4 }
 0x777   :  { %v2758_v57 = vpop.f32.mrb[8].mxu0 }
 0x778   :  { %v2076_v58 = vpop.f32.mrb[9].mxu0 }
 0x779   :  { %v811_v60 = vpop.f32.mrb[10].mxu0 }
 0x77a   :  { %v2077_v61 = vpop.f32.mrb[11].mxu0 }
 0x77e   :  { %v2760_v62 = vpop.f32.mrb[24].mxu1 }
 0x77f   :  { %v2169_v63 = vpack.i.bf16 %v2760_v62, %v2758_v57  ;;  %v2082_v0 = vpop.f32.mrb[25].mxu1 }
 0x780   :  { %v859_v1 = vpop.f32.mrb[26].mxu1 }
 0x781   :  { %v2083_v2 = vpop.f32.mrb[27].mxu1 }
 0x784   :  { %v906_v5 = vpop.f32.mrb[12].mxu0 }
 0x785   :  { %v2088_v6 = vpop.f32.mrb[13].mxu0  ;;  %v962_v7 = vsel %vm524_vm3, %v906_v5, -inf }
 0x786   :  { %963 = vmax.xlane.f32.xlu0 %v962_v7  ;;  %v909_v8 = vpop.f32.mrb[14].mxu0  ;;  %v956_v11 = vpop.f32.mrb[28].mxu1 }
 0x787   :  { %v2089_v12 = vpop.f32.mrb[15].mxu0  ;;  %v2094_v15 = vpop.f32.mrb[29].mxu1  ;;  %v965_v16 = vsel %vm524_vm3, %v956_v11, -inf }
 0x788   :  { %966 = vmax.xlane.f32.xlu1 %v965_v16  ;;  %v959_v17 = vpop.f32.mrb[30].mxu1 }
 0x789   :  { %v2095_v20 = vpop.f32.mrb[31].mxu1 }
 0x799   :  { %1034 = vrot.lane.b32.xlu1 %v2699_v50, %s2462_s0 }
 0x79d   :  { %1084 = vrot.lane.b32.xlu1 %v2656_v9, %s2469_s27 }
 0x7a1   :  { %1134 = vrot.lane.b32.xlu1 %v2661_v13, %s2469_s27 }
 0x7a5   :  { %1132 = vrot.lane.b32.xlu1 %v2674_v19, %s2469_s27 }
 0x813   :  { %v964_v21 = vpop.xlane.xlu0 %963 }
 0x814   :  { %v968_v22 = vsub.f32 %v906_v5, %v964_v21 }
 0x815   :  { %v967_v23 = vpop.xlane.xlu1 %966 }
 0x816   :  { %v970_v24 = vmul.f32 1.442695, %v968_v22  ;;  %v969_v25 = vsub.f32 %v956_v11, %v967_v23 }
 0x818   :  { %2284 = vpow2.f32 %v970_v24  ;;  %v972_v26 = vmul.f32 1.442695, %v969_v25 }
 0x819   :  { %v1035_v27 = vpop.permute.xlu1 %1034 }
 0x81a   :  { %2286 = vpow2.f32 %v972_v26  ;;  %v1040_v28 = vsel %vm552_vm2, %v1035_v27, 0 }
 0x81b   :  { %2103 = vmatpush3.bf16.msra.mxu1 %v1040_v28 }
 0x81c   :  { %2114 = vmatprep.subr.bf16.mxu1 %v2465_v4 }
 0x81d   :  { %v1085_v36 = vpop.permute.xlu1 %1084 }
 0x821   :  { %v1135_v41 = vpop.permute.xlu1 %1134 }
 0x822   :  { %v2285_v9 = vpop.eup %2284  ;;  %v1140_v43 = vsel %vm431_vm1, %v1135_v41, 0 }
 0x823   :  { %v974_v13 = vsel %vm524_vm3, %v2285_v9, 0.0 }
 0x824   :  { %v2287_v29 = vpop.eup %2286  ;;  %975 = vadd.xlane.f32.xlu0 %v974_v13 }
 0x825   :  { %v977_v19 = vsel %vm524_vm3, %v2287_v29, 0.0  ;;  %v1133_v46 = vpop.permute.xlu1 %1132 }
 0x828   :  { %978 = vadd.xlane.f32.xlu0 %v977_v19 }
 0x83e   :  { %986 = vrot.lane.b32.xlu0 %v2672_v18, %s2462_s0 }
 0x842   :  { %1082 = vrot.lane.b32.xlu0 %v2663_v14, %s2469_s27  ;;  %v1090_v14 = vsel %vm431_vm1, %v1085_v36, 0  ;;  %v2219_v36 = vld [vmem:[#allocation7 + $0x18] sm:$0xff]  }
 0x8b1   :  { %v976_v31 = vpop.xlane.xlu0 %975 }
 0x8b2   :  { %2288 = vrcp.f32 %v976_v31 }
 0x8b5   :  { %v979_v32 = vpop.xlane.xlu0 %978 }
 0x8b6   :  { %2290 = vrcp.f32 %v979_v32 }
 0x8b9   :  { %v987_v33 = vpop.permute.xlu0 %986 }
 0x8ba   :  { %v992_v34 = vsel %vm552_vm2, %v987_v33, 0  ;;  %v2216_v33 = vld [vmem:[#allocation7] sm:$0xff]  }
 0x8bb   :  { %2097 = vmatpush3.bf16.msra.mxu0 %v992_v34  ;;  %v2217_v34 = vld [vmem:[#allocation7 + $0x8] sm:$0xff]  }
 0x8bc   :  { %v2289_v35 = vpop.eup %2288  ;;  %2108 = vmatprep.subr.bf16.mxu0 %v2465_v4 }
 0x8bd   :  { %v982_v37 = vmul.f32 %v2289_v35, %v2285_v9  ;;  %v1083_v45 = vpop.permute.xlu0 %1082  ;;  %v2218_v35 = vld [vmem:[#allocation7 + $0x10] sm:$0xff]  }
 0x8bf   :  { %v984_v38 = vpack.c.bf16 %v982_v37, %v982_v37  ;;  %v2220_v37 = vld [vmem:[#allocation7 + $0x20] sm:$0xff]  }
 0x8c0   :  { %v2291_v39 = vpop.eup %2290 }
 0x8c1   :  { %v983_v40 = vmul.f32 %v2291_v39, %v2287_v29  ;;  %2099 = vmatmul.mubr.msk.bf16.vlgmr.msra.gmra.mrb[16].mxu0 %vm524_vm3, %v984_v38  ;;  %v2221_v38 = vld [vmem:[#allocation7 + $0x28] sm:$0xff]   ;;  %v2223_v39 = vld [vmem:[#allocation7 + $0x38] sm:$0xff]  }
 0x8c2   :  { %2110 = vmatprep.mubr.msk.bf16.mxu0 %vm2467_vm0, %v2465_v4 }
 0x8c3   :  { %v985_v42 = vpack.c.bf16 %v983_v40, %v983_v40 }
 0x8c4   :  { %2109 = vmatpush3.bf16.xpose.msra.mxu0 %v1090_v14 }
 0x8c5   :  { %2105 = vmatmul.mubr.msk.bf16.vlgmr.msra.gmra.mrb[32].mxu1 %vm524_vm3, %v985_v42  ;;  %2120 = vmatprep.subr.bf16.mxu0 %v2465_v4 }
 0x8c6   :  { %2115 = vmatpush3.bf16.xpose.msra.mxu1 %v1140_v43  ;;  %2116 = vmatprep.mubr.msk.bf16.mxu1 %vm2467_vm0, %v2465_v4 }
 0x8c7   :  { %2126 = vmatprep.subr.bf16.mxu1 %v2465_v4 }
 0x8cb   :  { %2111 = vmatmul.mubr.msk.bf16.vlgmr.msra.gmra.mrb[20].mxu0 %vm431_vm1, %v1083_v45 }
 0x8cc   :  { %2122 = vmatprep.mubr.msk.bf16.mxu0 %vm2467_vm0, %v2465_v4 }
 0x8cd   :  { %2117 = vmatmul.mubr.msk.bf16.vlgmr.msra.gmra.mrb[36].mxu1 %vm431_vm1, %v1133_v46 }
 0x8ce   :  { %2128 = vmatprep.mubr.msk.bf16.mxu1 %vm2467_vm0, %v2465_v4 }
 0x994   :  { %v1028_v47 = vpop.f32.mrb[16].mxu0 }
 0x995   :  { %v2100_v49 = vpop.f32.mrb[17].mxu0 }
 0x996   :  { %v1031_v51 = vpop.f32.mrb[18].mxu0 }
 0x997   :  { %v2101_v52 = vpop.f32.mrb[19].mxu0 }
 0x998   :  { %v1076_v53 = vpop.f32.mrb[32].mxu1 }
 0x999   :  { %v2174_v56 = vpack.i.bf16 %v1076_v53, %v1028_v47  ;;  %v2106_v58 = vpop.f32.mrb[33].mxu1 }
 0x99a   :  { %v1079_v60 = vpop.f32.mrb[34].mxu1 }
 0x99b   :  { %v2107_v61 = vpop.f32.mrb[35].mxu1 }
 0x99e   :  { %v1126_v0 = vpop.f32.mrb[20].mxu0 }
 0x99f   :  { %v2112_v1 = vpop.f32.mrb[21].mxu0  ;;  %v1182_v2 = vsel %vm524_vm3, %v1126_v0, -inf }
 0x9a0   :  { %1183 = vmax.xlane.f32.xlu0 %v1182_v2  ;;  %v1129_v5 = vpop.f32.mrb[22].mxu0  ;;  %v1176_v6 = vpop.f32.mrb[36].mxu1 }
 0x9a1   :  { %v2113_v7 = vpop.f32.mrb[23].mxu0  ;;  %v2118_v8 = vpop.f32.mrb[37].mxu1  ;;  %v1185_v11 = vsel %vm524_vm3, %v1176_v6, -inf }
 0x9a2   :  { %1186 = vmax.xlane.f32.xlu1 %v1185_v11  ;;  %v1179_v12 = vpop.f32.mrb[38].mxu1 }
 0x9a3   :  { %v2119_v15 = vpop.f32.mrb[39].mxu1  ;;  %v1896_v12 = vld [vmem:[%s2881_s6] ss:$0 sm:$0xff] }
 0x9b3   :  { %1254 = vrot.lane.b32.xlu1 %v2699_v50, %s2469_s27 }
 0x9b7   :  { %2170 = vrot.lane.b32.xlu1 %v2169_v63, %s2469_s27 }
 0x9bb   :  { %2175 = vrot.lane.b32.xlu1 %v2174_v56, %s2462_s0 }
 0xa2d   :  { %v1184_v16 = vpop.xlane.xlu0 %1183 }
 0xa2e   :  { %v1188_v17 = vsub.f32 %v1126_v0, %v1184_v16 }
 0xa2f   :  { %v1187_v20 = vpop.xlane.xlu1 %1186 }
 0xa30   :  { %v1190_v21 = vmul.f32 1.442695, %v1188_v17  ;;  %v1189_v22 = vsub.f32 %v1176_v6, %v1187_v20 }
 0xa32   :  { %2292 = vpow2.f32 %v1190_v21  ;;  %v1192_v23 = vmul.f32 1.442695, %v1189_v22 }
 0xa33   :  { %v1255_v24 = vpop.permute.xlu1 %1254 }
 0xa34   :  { %2294 = vpow2.f32 %v1192_v23  ;;  %v1260_v25 = vsel %vm552_vm2, %v1255_v24, 0  ;;  %v2313_v23 = vld [vmem:[#allocation2 + $0x8] sm:$0xff] }
 0xa35   :  { %2127 = vmatpush3.bf16.msra.mxu1 %v1260_v25  ;;  %v2224_v25 = vld [vmem:[#allocation8] ss:$8 sps:$4 sm:$0xff]  }
 0xa37   :  { %v2171_v51 = vpop.permute.xlu1 %2170 }
 0xa38   :  { %v2173_v53 = vunpack.i.h.bf16 %v2171_v51  ;;  %v2172_v56 = vunpack.i.l.bf16 %v2171_v51 }
 0xa3a   :  { %v1327_v61 = vsel %vm431_vm1, %v2721_v10, %v2173_v53  ;;  %v1326_v0 = vsel %vm431_vm1, %v2719_v3, %v2172_v56  ;;  %v2312_v10 = vld [vmem:[#allocation2] sm:$0xff] }
 0xa3b   :  { %v2176_v52 = vpop.permute.xlu1 %2175 }
 0xa3c   :  { %v2293_v50 = vpop.eup %2292  ;;  %v2178_v58 = vunpack.i.h.bf16 %v2176_v52  ;;  %v2177_v60 = vunpack.i.l.bf16 %v2176_v52 }
 0xa3d   :  { %v1194_v26 = vsel %vm524_vm3, %v2293_v50, 0.0 }
 0xa3e   :  { %v2295_v27 = vpop.eup %2294  ;;  %1195 = vadd.xlane.f32.xlu0 %v1194_v26  ;;  %v1329_v5 = vsel %vm1328_vm4, %v1326_v0, %v2177_v60  ;;  %v1330_v6 = vsel %vm1328_vm4, %v1327_v61, %v2178_v58  ;;  %v2229_v26 = vld [vmem:[#allocation8 + $0x14] ss:$8 sps:$4 sm:$0xff]  }
 0xa3f   :  { %v1197_v57 = vsel %vm524_vm3, %v2295_v27, 0.0 }
 0xa42   :  { %1198 = vadd.xlane.f32.xlu0 %v1197_v57 }
 0xa58   :  { %1206 = vrot.lane.b32.xlu0 %v2672_v18, %s2469_s27 }
 0xacb   :  { %v1196_v62 = vpop.xlane.xlu0 %1195 }
 0xacc   :  { %2296 = vrcp.f32 %v1196_v62 }
 0xacf   :  { %v1199_v63 = vpop.xlane.xlu0 %1198 }
 0xad0   :  { %2298 = vrcp.f32 %v1199_v63 }
 0xad3   :  { %v1207_v28 = vpop.permute.xlu0 %1206 }
 0xad4   :  { %v1212_v9 = vsel %vm552_vm2, %v1207_v28, 0 }
 0xad5   :  { %2121 = vmatpush3.bf16.msra.mxu0 %v1212_v9 }
 0xad6   :  { %v2297_v13 = vpop.eup %2296  ;;  %2132 = vmatprep.subr.bf16.mxu0 %v2465_v4 }
 0xad7   :  { %v1202_v29 = vmul.f32 %v2297_v13, %v2293_v50  ;;  %v2226_v50 = vld [vmem:[#allocation8 + $0x4] ss:$8 sps:$4 sm:$0xff]  }
 0xad8   :  { %1584 = vmatprep.subr.bf16.mxu1 %v2226_v50 }
 0xad9   :  { %v1204_v19 = vpack.c.bf16 %v1202_v29, %v1202_v29 }
 0xada   :  { %v2299_v31 = vpop.eup %2298 }
 0xadb   :  { %v1203_v32 = vmul.f32 %v2299_v31, %v2295_v27  ;;  %2123 = vmatmul.mubr.msk.bf16.vlgmr.msra.gmra.mrb[24].mxu0 %vm524_vm3, %v1204_v19  ;;  %v2227_v27 = vld [vmem:[#allocation8 + $0x10] ss:$8 sps:$4 sm:$0xff]   ;;  %v2232_v31 = vld [vmem:[#allocation8 + $0x24] ss:$8 sps:$4 sm:$0xff]  }
 0xadc   :  { %2148 = vmatprep.mubr.msk.bf16.mxu0 %vm2467_vm0, %v2465_v4  ;;  %2133 = vmatpush3.bf16.msra.mxu0 %v2216_v33  ;;  %v2233_v33 = vld [vmem:[#allocation8 + $0x30] ss:$8 sps:$4 sm:$0xff]  }
 0xadd   :  { %v1205_v18 = vpack.c.bf16 %v1203_v32, %v1203_v32  ;;  %2134 = vmatprep.subr.bf16.mxu0 %v2465_v4  ;;  %v2230_v32 = vld [vmem:[#allocation8 + $0x20] ss:$8 sps:$4 sm:$0xff]  }
 0xadf   :  { %2129 = vmatmul.mubr.msk.bf16.vlgmr.msra.gmra.mrb[40].mxu1 %vm524_vm3, %v1205_v18  ;;  %v2235_v18 = vld [vmem:[#allocation8 + $0x34] ss:$8 sps:$4 sm:$0xff]  }
 0xae0   :  { %1616 = vmatprep.mubr.bf16.mxu1 %v2466_v30  ;;  %2135 = vmatpush3.bf16.msra.mxu0 %v2217_v34  ;;  %v2222_v30 = vld [vmem:[#allocation7 + $0x30] sm:$0xff]   ;;  %v2238_v34 = vld [vmem:[#allocation8 + $0x44] ss:$8 sps:$4 sm:$0xff]  }
 0xae1   :  { %2136 = vmatprep.subr.bf16.mxu0 %v2465_v4  ;;  %1585 = vmatpush1.bf16.msra.mxu1 %v2224_v25 }
 0xae2   :  { %1586 = vmatprep.subr.bf16.mxu1 %v2229_v26 }
 0xae4   :  { %2137 = vmatpush3.bf16.msra.mxu0 %v2218_v35  ;;  %v2236_v35 = vld [vmem:[#allocation8 + $0x40] ss:$8 sps:$4 sm:$0xff]  }
 0xae5   :  { %2138 = vmatprep.subr.bf16.mxu0 %v2465_v4  ;;  %1587 = vmatpush1.bf16.msra.mxu1 %v2227_v27 }
 0xae6   :  { %1588 = vmatprep.subr.bf16.mxu1 %v2232_v31 }
 0xae8   :  { %2139 = vmatpush3.bf16.msra.mxu0 %v2219_v36  ;;  %v2241_v36 = vld [vmem:[#allocation8 + $0x54] ss:$8 sps:$4 sm:$0xff]  }
 0xae9   :  { %2140 = vmatprep.subr.bf16.mxu0 %v2465_v4  ;;  %1589 = vmatpush1.bf16.msra.mxu1 %v2230_v32 }
 0xaea   :  { %1590 = vmatprep.subr.bf16.mxu1 %v2235_v18 }
 0xaec   :  { %2141 = vmatpush3.bf16.msra.mxu0 %v2220_v37  ;;  %v2239_v37 = vld [vmem:[#allocation8 + $0x50] ss:$8 sps:$4 sm:$0xff]  }
 0xaed   :  { %2142 = vmatprep.subr.bf16.mxu0 %v2465_v4  ;;  %1591 = vmatpush1.bf16.msra.mxu1 %v2233_v33 }
 0xaee   :  { %1592 = vmatprep.subr.bf16.mxu1 %v2238_v34 }
 0xaf0   :  { %2143 = vmatpush3.bf16.msra.mxu0 %v2221_v38  ;;  %v2244_v38 = vld [vmem:[#allocation8 + $0x64] ss:$8 sps:$4 sm:$0xff]  }
 0xaf1   :  { %2144 = vmatprep.subr.bf16.mxu0 %v2465_v4  ;;  %1593 = vmatpush1.bf16.msra.mxu1 %v2236_v35 }
 0xaf2   :  { %1594 = vmatprep.subr.bf16.mxu1 %v2241_v36 }
 0xaf4   :  { %2145 = vmatpush3.bf16.msra.mxu0 %v2222_v30  ;;  %v2242_v30 = vld [vmem:[#allocation8 + $0x60] ss:$8 sps:$4 sm:$0xff]  }
 0xaf5   :  { %2146 = vmatprep.subr.bf16.mxu0 %v2465_v4  ;;  %1595 = vmatpush1.bf16.msra.mxu1 %v2239_v37 }
 0xaf6   :  { %1596 = vmatprep.subr.bf16.mxu1 %v2244_v38 }
 0xaf8   :  { %2147 = vmatpush3.bf16.msra.mxu0 %v2223_v39  ;;  %v2247_v39 = vld [vmem:[#allocation8 + $0x74] ss:$8 sps:$4 sm:$0xff]  }
 0xaf9   :  { %1597 = vmatpush1.bf16.msra.mxu1 %v2242_v30 }
 0xafa   :  { %1598 = vmatprep.subr.bf16.mxu1 %v2247_v39 }
 0xbae   :  { %v1248_v40 = vpop.f32.mrb[24].mxu0 }
 0xbaf   :  { %v2124_v41 = vpop.f32.mrb[25].mxu0 }
 0xbb0   :  { %v1251_v14 = vpop.f32.mrb[26].mxu0  ;;  %v2248_v41 = vld [vmem:[#allocation10 + $0x40] sm:$0xff]  }
 0xbb1   :  { %v2125_v42 = vpop.f32.mrb[27].mxu0  ;;  %v2249_v14 = vld [vmem:[#allocation10] sm:$0xff]   ;;  %1994 = vmatprep.subr.bf16.mxu0 %v2248_v41 }
 0xbb2   :  { %v1296_v43 = vpop.f32.mrb[40].mxu1  ;;  %v2250_v42 = vld [vmem:[#allocation10 + $0x48] sm:$0xff]  }
 0xbb3   :  { %v2179_v45 = vpack.i.bf16 %v1296_v43, %v1248_v40  ;;  %v2130_v46 = vpop.f32.mrb[41].mxu1  ;;  %v2245_v40 = vld [vmem:[#allocation8 + $0x70] ss:$8 sps:$4 sm:$0xff]   ;;  %v2251_v43 = vld [vmem:[#allocation10 + $0x8] sm:$0xff]  }
 0xbb4   :  { %v1299_v47 = vpop.f32.mrb[42].mxu1  ;;  %1599 = vmatpush1.bf16.msra.mxu1 %v2245_v40 }
 0xbb5   :  { %2180 = vrot.lane.b32.xlu0 %v2179_v45, %s2468_s4  ;;  %v2131_v49 = vpop.f32.mrb[43].mxu1 }
 0xc27   :  { %v2181_v4 = vpop.permute.xlu0 %2180 }
 0xc28   :  { %v2183_v1 = vunpack.i.h.bf16 %v2181_v4  ;;  %v2182_v2 = vunpack.i.l.bf16 %v2181_v4 }
 0xc2a   :  { %v1333_v7 = vsel %vm1331_vm5, %v1330_v6, %v2183_v1  ;;  %v1332_v8 = vsel %vm1331_vm5, %v1329_v5, %v2182_v2  ;;  %v2252_v5 = vld [vmem:[#allocation10 + $0x50] sm:$0xff]  }
 0xc2b   :  { %v1334_v11 = vpack.c.bf16 %v1333_v7, %v1332_v8  ;;  %v2253_v6 = vld [vmem:[#allocation10 + $0x10] sm:$0xff]   ;;  %v2254_v7 = vld [vmem:[#allocation10 + $0x58] sm:$0xff]  }
 0xc2c   :  { %v2255_v8 = vld [vmem:[#allocation10 + $0x18] sm:$0xff]  }
 0xc2d   :  { %2149 = vmatmul.mubr.bf16.vlgmr.msra.gmra.mrb[28].mxu0 %v1334_v11  ;;  %v2256_v11 = vld [vmem:[#allocation10 + $0x60] sm:$0xff]  }
 0xc2e   :  { %1995 = vmatpush3.bf16.msra.mxu0 %v2249_v14 }
 0xc2f   :  { %1996 = vmatprep.subr.bf16.mxu0 %v2250_v42 }
 0xc32   :  { %1997 = vmatpush3.bf16.msra.mxu0 %v2251_v43  ;;  %v1921_v43 = vld [vmem:[%s2885_s10] ss:$0 sm:$0xff] }
 0xc33   :  { %1998 = vmatprep.subr.bf16.mxu0 %v2252_v5 }
 0xc36   :  { %1999 = vmatpush3.bf16.msra.mxu0 %v2253_v6 }
 0xc37   :  { %2000 = vmatprep.subr.bf16.mxu0 %v2254_v7 }
 0xc3a   :  { %2001 = vmatpush3.bf16.msra.mxu0 %v2255_v8 }
 0xc3b   :  { %2002 = vmatprep.subr.bf16.mxu0 %v2256_v11 }
 0xd00   :  { %v1440_v15 = vpop.f32.mrb[28].mxu0 }
 0xd01   :  { %v1441_v16 = vadd.f32 %v1896_v12, %v1440_v15  ;;  %v2150_v17 = vpop.f32.mrb[29].mxu0  ;;  %v2258_v15 = vld [vmem:[#allocation10 + $0x68] sm:$0xff]  }
 0xd02   :  { %v1443_v20 = vpop.f32.mrb[30].mxu0  ;;  %v2262_v17 = vld [vmem:[#allocation10 + $0x78] sm:$0xff]  }
 0xd03   :  { %v2836_v21 = vadd.f32 %v2312_v10, %v1441_v16  ;;  %v1444_v3 = vadd.f32 %v1896_v12, %v1443_v20  ;;  %v2151_v22 = vpop.f32.mrb[31].mxu0  ;;  %v2257_v12 = vld [vmem:[#allocation10 + $0x20] sm:$0xff]   ;;  %v2260_v16 = vld [vmem:[#allocation10 + $0x70] sm:$0xff]   ;;  %v2263_v20 = vld [vmem:[#allocation10 + $0x38] sm:$0xff]  }
 0xd04   :  { %2003 = vmatpush3.bf16.msra.mxu0 %v2257_v12  ;;  %v1492_v10 = vld [vmem:[%s2883_s8] sm:$0x3] }
 0xd05   :  { %v2838_v24 = vadd.f32 %v2313_v23, %v1444_v3  ;;  %1449 = vadd.xlane.f32.xlu1 %v2836_v21  ;;  %2004 = vmatprep.subr.bf16.mxu0 %v2258_v15  ;;  %v1497_v3 = vrot.slane %v1492_v10, %v188_v59  ;;  %v1501_v22 = vrot.slane %v1492_v10, %v192_v55 }
 0xd07   :  { %1451 = vadd.xlane.f32.xlu0 %v2838_v24 }
 0xd92   :  { %v1450_v57 = vpop.xlane.xlu1 %1449 }
 0xd93   :  { %v1453_v62 = vmul.f32 0.0078125, %v1450_v57 }
 0xd94   :  { %v1452_v63 = vpop.xlane.xlu0 %1451 }
 0xd95   :  { %v1455_v28 = vsub.f32 %v2836_v21, %v1453_v62  ;;  %v1454_v9 = vmul.f32 0.0078125, %v1452_v63 }
 0xd97   :  { %v1456_v13 = vsub.f32 %v2838_v24, %v1454_v9  ;;  %v1457_v29 = vmul.f32 %v1455_v28, %v1455_v28 }
 0xd99   :  { %1459 = vadd.xlane.f32.xlu0 %v1457_v29  ;;  %v1458_v19 = vmul.f32 %v1456_v13, %v1456_v13 }
 0xd9d   :  { %1461 = vadd.xlane.f32.xlu0 %v1458_v19 }
 0xe26   :  { %v1460_v45 = vpop.xlane.xlu0 %1459 }
 0xe27   :  { %v1463_v46 = vmul.f32 0.0078125, %v1460_v45 }
 0xe29   :  { %v1465_v47 = vadd.f32 1e-05, %v1463_v46 }
 0xe2a   :  { %v1462_v49 = vpop.xlane.xlu0 %1461 }
 0xe2b   :  { %2300 = vrsqrt.f32 %v1465_v47  ;;  %v1464_v51 = vmul.f32 0.0078125, %v1462_v49 }
 0xe2d   :  { %v1466_v52 = vadd.f32 1e-05, %v1464_v51 }
 0xe2f   :  { %2302 = vrsqrt.f32 %v1466_v52 }
 0xe35   :  { %v2301_v53 = vpop.eup %2300 }
 0xe36   :  { %v1469_v56 = vmul.f32 %v2301_v53, %v1455_v28 }
 0xe38   :  { %v1471_v4 = vmul.f32 %v2626_v44, %v1469_v56 }
 0xe39   :  { %v2303_v58 = vpop.eup %2302 }
 0xe3a   :  { %v1470_v60 = vmul.f32 %v2303_v58, %v1456_v13  ;;  %v1473_v0 = vadd.f32 %v2633_v48, %v1471_v4 }
 0xe3c   :  { %v1472_v61 = vmul.f32 %v2626_v44, %v1470_v60  ;;  %v2259_v44 = vld [vmem:[#allocation10 + $0x28] sm:$0xff]  }
 0xe3d   :  { %2005 = vmatpush3.bf16.msra.mxu0 %v2259_v44 }
 0xe3e   :  { %v1474_v1 = vadd.f32 %v2633_v48, %v1472_v61  ;;  %v2261_v48 = vld [vmem:[#allocation10 + $0x30] sm:$0xff]   ;;  %2006 = vmatprep.subr.bf16.mxu0 %v2260_v16 }
 0xe40   :  { %v1475_v2 = vpack.c.bf16 %v1474_v1, %v1473_v0 }
 0xe41   :  { %2007 = vmatpush3.bf16.msra.mxu0 %v2261_v48 }
 0xe42   :  { %1617 = vmatmul.mubr.bf16.vlgmr.msra.gmra.mrb[44].mxu1 %v1475_v2  ;;  %2008 = vmatprep.subr.bf16.mxu0 %v2262_v17 }
 0xe45   :  { %2009 = vmatpush3.bf16.msra.mxu0 %v2263_v20 }
 0xf15   :  { %v1618_v23 = vpop.f32.mrb[44].mxu1 }
 0xf16   :  { %v1619_v25 = vadd.f32 %v1618_v23, %v1497_v3  ;;  %v1620_v50 = vpop.f32.mrb[45].mxu1 }
 0xf17   :  { %v1621_v26 = vadd.f32 %v1620_v50, %v1501_v22  ;;  %v1622_v27 = vpop.f32.mrb[46].mxu1 }
 0xf18   :  { %v1631_v57 = vmul.f32 0.70710677, %v1619_v25  ;;  %v1623_v62 = vadd.f32 %v1622_v27, %v1497_v3  ;;  %v1624_v63 = vpop.f32.mrb[47].mxu1  ;;  %v1627_v18 = vmul.f32 0.5, %v1619_v25 }
 0xf19   :  { %v1632_v28 = vmul.f32 0.70710677, %v1621_v26  ;;  %v1625_v9 = vadd.f32 %v1624_v63, %v1501_v22  ;;  %v1628_v35 = vmul.f32 0.5, %v1621_v26 }
 0xf1a   :  { %2304 = verf.f32 %v1631_v57  ;;  %v1633_v13 = vmul.f32 0.70710677, %v1623_v62  ;;  %v1629_v33 = vmul.f32 0.5, %v1623_v62 }
 0xf1b   :  { %2306 = verf.f32 %v1632_v28  ;;  %v1634_v29 = vmul.f32 0.70710677, %v1625_v9  ;;  %v1630_v36 = vmul.f32 0.5, %v1625_v9 }
 0xf1c   :  { %2308 = verf.f32 %v1633_v13 }
 0xf1d   :  { %2310 = verf.f32 %v1634_v29 }
 0xf24   :  { %v2305_v59 = vpop.eup %2304 }
 0xf25   :  { %v2307_v19 = vpop.eup %2306  ;;  %v1639_v54 = vadd.f32 1.0, %v2305_v59 }
 0xf26   :  { %v2309_v55 = vpop.eup %2308  ;;  %v1640_v31 = vadd.f32 1.0, %v2307_v19 }
 0xf27   :  { %v2311_v32 = vpop.eup %2310  ;;  %v1641_v34 = vadd.f32 1.0, %v2309_v55  ;;  %v1643_v38 = vmul.f32 %v1639_v54, %v1627_v18 }
 0xf28   :  { %v1642_v37 = vadd.f32 1.0, %v2311_v32  ;;  %v1644_v39 = vmul.f32 %v1640_v31, %v1628_v35 }
 0xf29   :  { %v1645_v30 = vmul.f32 %v1641_v34, %v1629_v33 }
 0xf2a   :  { %v1646_v40 = vmul.f32 %v1642_v37, %v1630_v36 }
 0xf2b   :  { %v1647_v41 = vpack.c.bf16 %v1645_v30, %v1643_v38 }
 0xf2c   :  { %v1648_v14 = vpack.c.bf16 %v1646_v40, %v1644_v39 }
 0xf2e   :  { %1816 = vmatprep.mubr.bf16.mxu0 %v1648_v14 }
 0xf2f   :  { %1817 = vmatmul.mubr.bf16.vlgmr.msra.gmra.mrb[32].mxu0 %v1647_v41 }
0x1002   :  { %v2010_v42 = vpop.f32.mrb[32].mxu0 }
0x1003   :  { %v2011_v45 = vpop.f32.mrb[33].mxu0 }
0x1004   :  { %v2012_v46 = vadd.f32 %v2011_v45, %v2010_v42  ;;  %v2013_v47 = vpop.f32.mrb[34].mxu0 }
0x1005   :  { %v2014_v49 = vpop.f32.mrb[35].mxu0 }
0x1006   :  { %v1819_v51 = vadd.f32 %v2012_v46, %v1921_v43  ;;  %v2015_v52 = vadd.f32 %v2014_v49, %v2013_v47 }
0x1008   :  { %v1825_v53 = vadd.f32 %v1819_v51, %v2836_v21  ;;  %v1822_v56 = vadd.f32 %v2015_v52, %v1921_v43 }
0x100a   :  { %1827 = vst [vmem:[#allocation11] sm:$0xff] %v1825_v53  ;;  %v1826_v58 = vadd.f32 %v1822_v56, %v2838_v24 }
0x100c   :  { %1828 = vst [vmem:[#allocation11 + $0x8] sm:$0xff] %v1826_v58 }
0x100d   :  { %2435 = shalt.err (!%p2432_p2)
}
0x100e   :  { %s2436_s17 = scalar_lea.hbm %s2886_s11, 256 }
0x100f   :  { %p2437_p3 = scmp.ne.s32.totalorder %s2886_s11, %s2436_s17  ;;  %p2440_p4 = scmp.lt.u32.totalorder %s2436_s17, %s2886_s11 }
0x1011   :  { %p2442_p5 = pnand %p2440_p4, %p2437_p3 }
0x1013   :  { %2445 = shalt.err (!%p2442_p5)
}
0x1014   :  { %1840 = dma.vmem_to_hbm [thread:$0]  %s1835_s12, 256, %s2886_s11, [#allocation4], %s2459_s18, %s2459_s18, %s2460_s24  }
0x1015   :  { %2452 = dma.done.wait [#allocation4], 256  }
0x1016   :  { %2453 = vsyncadd [#allocation4], 4294967040 }
0x1017   :  { %1844 = vsyncpa [#allocation3], 1 }
0x1018   :  { %1845 = vsyncpa [#allocation6], 1 }
0x1019   :  { %1846 = vsyncpa [#allocation9], 1 }
0x101a   :  { %1847 = vsyncpa [#allocation4], 1 }

</bundles_post_ra>
